<compile_context>
chip_gen: v6e
topology: v6e:2x2x1
jax: 0.10.0
libtpu: 0.0.40
codegen_flags: <defaults>
</compile_context>

<pallas_src>
import jax
import jax.numpy as jnp
import numpy as np
from jax.experimental import pallas as pl
from jax.experimental.pallas import tpu as pltpu


def shutel_kernel(x_ref, wih0_t_ref, wih_t_ref, whh_t_ref, b_ref,
                  w1_ref, b1_ref, w2_ref, b2_ref, out_ref, gx_ref):
    # x_ref:      [T, BT, D0]      time-major layer-0 input tile (features padded 6->8)
    # wih0_t_ref: [D0, 4H]         layer-0 W_ih^T (rows zero-padded 6->8), bf16
    # wih_t_ref:  [max(L-1,1), H, 4H]  W_ih^T for layers 1..L-1, bf16
    # whh_t_ref:  [L, H, 4H]       W_hh^T, bf16
    # b_ref:      [L, 1, 4H]       b_ih + b_hh, f32
    # w1_ref:     [H, H//4] bf16, b1_ref: [1, H//4] f32
    # w2_ref:     [H//4, 1] bf16, b2_ref: [1, 1]    f32
    # out_ref:    [BT, 1]
    # gx_ref:     [T*BT, 4H] VMEM  per-timestep gate pre-activations of the
    #                              *current* layer; overwritten in place with
    #                              the next layer's pre-activations.
    # Gate column order in all packed weights/biases is (i, f, o, g); the i/f/o
    # columns (and bias entries) are pre-scaled by 0.5 for the tanh-only trick.
    L, H, _ = whh_t_ref.shape
    T, BT, _ = x_ref.shape
    H3 = 3 * H

    # Batch sub-group interleaving: two independent recurrences in flight when
    # the tile is wide enough (keeps MXU/EUP busy while the other group waits).
    NG = 2 if (BT >= 16 and BT % 16 == 0) else 1
    GB = BT // NG

    wih0 = wih0_t_ref[...]
    bf = wih0.dtype
    b0 = b_ref[0]

    # ---- hoisted layer-0 input projection: T independent MXU matmuls written
    #      straight into the gx scratch (lane-dense 4H-wide stores), all off the
    #      recurrence's serial chain ----
    for t in range(T):
        gx_ref[t * BT:(t + 1) * BT, :] = (
            jnp.dot(x_ref[t].astype(bf), wih0,
                    preferred_element_type=jnp.float32) + b0)

    hs = [jnp.zeros((GB, H), jnp.float32) for _ in range(NG)]
    for l in range(L):                        # static, small layer count
        whh = whh_t_ref[l]                    # [H, 4H]
        last_layer = (l == L - 1)
        if not last_layer:
            wih_nxt = wih_t_ref[l]            # W_ih^T of layer l+1
            b_nxt = b_ref[l + 1]
        hs = [jnp.zeros((GB, H), jnp.float32) for _ in range(NG)]
        cs = [jnp.zeros((GB, H), jnp.float32) for _ in range(NG)]

        # ---- fully unrolled recurrence: only h @ W_hh on the critical path ----
        for t in range(T):
            for g in range(NG):
                r0 = t * BT + g * GB
                gates = gx_ref[r0:r0 + GB, :] + jnp.dot(
                    hs[g].astype(bf), whh, preferred_element_type=jnp.float32)
                # single full-width tanh; 0.5*tanh(x/2)+0.5 == sigmoid(x) since
                # the i/f/o columns were pre-scaled by 0.5 offline.
                tnh = jnp.tanh(gates)                    # [GB, 4H]
                sig = 0.5 * tnh[:, :H3] + 0.5            # i | f | o
                g_g = tnh[:, H3:]                        # g
                cs[g] = sig[:, H:2 * H] * cs[g] + sig[:, :H] * g_g
                hs[g] = sig[:, 2 * H:H3] * jnp.tanh(cs[g])
                if not last_layer:
                    # Fuse the next layer's input projection into this step and
                    # overwrite the already-consumed gx slice (lane-dense store,
                    # no between-layer matmul bubble).
                    gx_ref[r0:r0 + GB, :] = (
                        jnp.dot(hs[g].astype(bf), wih_nxt,
                                preferred_element_type=jnp.float32) + b_nxt)

    # ---- MLP head on the last timestep's hidden state ----
    h_last = hs[0] if NG == 1 else jnp.concatenate(hs, axis=0)   # [BT, H]
    z1 = jnp.dot(h_last.astype(w1_ref.dtype), w1_ref[...],
                 preferred_element_type=jnp.float32) + b1_ref[...]
    z1 = jnp.where(z1 > 0, z1, 0.1 * z1)             # LeakyReLU(0.1)
    z2 = jnp.dot(z1.astype(w2_ref.dtype), w2_ref[...],
                 preferred_element_type=jnp.float32) + b2_ref[...]
    out_ref[...] = jax.nn.sigmoid(z2)                # [BT, 1]


# ----------------------------- parameter plumbing -----------------------------

def init_raw_params(key, hidden_dim, lstm_layers, input_dim=6):
    """Deterministic synthetic parameters in PyTorch nn.LSTM / nn.Linear layout."""
    H, L = hidden_dim, lstm_layers
    k = 1.0 / jnp.sqrt(jnp.float32(H))
    keys = jax.random.split(key, 4 * L + 4)
    ki = iter(range(len(keys)))

    def u(kk, shape, s=k):
        return jax.random.uniform(kk, shape, jnp.float32, -s, s)

    raw = dict(w_ih=[], w_hh=[], b_ih=[], b_hh=[])
    for l in range(L):
        in_dim = input_dim if l == 0 else H
        raw["w_ih"].append(u(keys[next(ki)], (4 * H, in_dim)))   # gate order i,f,g,o
        raw["w_hh"].append(u(keys[next(ki)], (4 * H, H)))
        raw["b_ih"].append(u(keys[next(ki)], (4 * H,)))
        raw["b_hh"].append(u(keys[next(ki)], (4 * H,)))
    Hq = H // 4
    kq = 1.0 / jnp.sqrt(jnp.float32(Hq))
    raw["w1"] = u(keys[next(ki)], (Hq, H))
    raw["b1"] = u(keys[next(ki)], (Hq,))
    raw["w2"] = u(keys[next(ki)], (1, Hq), kq)
    raw["b2"] = u(keys[next(ki)], (1,), kq)
    return raw


def _reorder_gates(w, H):
    # columns stacked (i, f, g, o) -> (i, f, o, g)
    return jnp.concatenate(
        [w[..., :2 * H], w[..., 3 * H:4 * H], w[..., 2 * H:3 * H]], axis=-1)


def _halve_ifo(w, H):
    # scale the i/f/o columns by 0.5 so sigmoid(x) == 0.5*tanh(x_scaled)+0.5
    return jnp.concatenate([0.5 * w[..., :3 * H], w[..., 3 * H:]], axis=-1)


def pack_params(raw, weight_dtype=jnp.bfloat16, d0_pad=8):
    """Transpose, gate-reorder, 0.5-scale i/f/o, pad and dtype-cast weights."""
    H = raw["w_hh"][0].shape[1]
    L = len(raw["w_hh"])
    wih_rest, whh_t, bias = [], [], []
    wih0_t = None
    for l in range(L):
        w_ih_t = _halve_ifo(_reorder_gates(raw["w_ih"][l].T, H), H)   # [in, 4H]
        w_hh_t = _halve_ifo(_reorder_gates(raw["w_hh"][l].T, H), H)   # [H, 4H]
        b = _halve_ifo(_reorder_gates(
            (raw["b_ih"][l] + raw["b_hh"][l])[None, :], H), H)
        if l == 0:
            in_dim = w_ih_t.shape[0]
            wih0_t = jnp.pad(w_ih_t, ((0, d0_pad - in_dim), (0, 0)))  # [8, 4H]
        else:
            wih_rest.append(w_ih_t)
        whh_t.append(w_hh_t)
        bias.append(b)
    if not wih_rest:   # L == 1: dummy (never read; layer loop is static)
        wih_rest.append(jnp.zeros((H, 4 * H), jnp.float32))
    wd = weight_dtype
    return dict(
        wih0_t=wih0_t.astype(wd),
        wih_t=jnp.stack(wih_rest).astype(wd),    # [L-1, H, 4H]
        whh_t=jnp.stack(whh_t).astype(wd),       # [L, H, 4H]
        b=jnp.stack(bias),                       # [L, 1, 4H] f32
        w1=raw["w1"].T.astype(wd), b1=raw["b1"][None, :],
        w2=raw["w2"].T.astype(wd), b2=raw["b2"][None, :],
    )


# --------------------------------- wrapper ------------------------------------

def _full_spec(a):
    nd = a.ndim
    return pl.BlockSpec(tuple(a.shape), lambda i, _nd=nd: (0,) * _nd)


@jax.jit
def shutel_forward(x, params):
    """x: [B, T, 6] float32 (PyTorch batch_first layout). Returns [B]."""
    B, T, Din = x.shape
    H = params["whh_t"].shape[1]
    D0 = params["wih0_t"].shape[0]

    # Batch tiling: one program per B_TILE rows; parallel grid -> both v7x TCs.
    BP8 = ((B + 7) // 8) * 8
    if BP8 <= 256:
        B_TILE, BP = BP8, BP8
    else:
        B_TILE = 256
        BP = ((B + 255) // 256) * 256
    num_tiles = BP // B_TILE

    # TODO(synk): for very large B*T the pad+transpose below costs one extra HBM
    #             round trip of x; an index_map-based time-major view (or
    #             allow_input_fusion) would remove it.
    x = x.astype(jnp.float32)
    x = jnp.pad(x, ((0, BP - B), (0, 0), (0, D0 - Din)))
    x_tm = jnp.transpose(x, (1, 0, 2))                     # [T, BP, D0] time-major

    # Per-tile VMEM footprint (double-buffered x block + gx scratch + weights).
    w_bytes = sum(int(np.prod(v.shape)) * v.dtype.itemsize for v in params.values())
    footprint = (2 * T * B_TILE * D0 * 4
                 + T * B_TILE * 4 * H * 4
                 + 2 * w_bytes)
    vmem_limit = int(min(64 * 2 ** 20, max(32 * 2 ** 20, 2 * footprint)))

    grid_spec = pltpu.PrefetchScalarGridSpec(
        num_scalar_prefetch=0,
        grid=(num_tiles,),
        in_specs=[
            pl.BlockSpec((T, B_TILE, D0), lambda i: (0, i, 0)),
            _full_spec(params["wih0_t"]),   # constant index maps: weights DMA'd once
            _full_spec(params["wih_t"]),
            _full_spec(params["whh_t"]),
            _full_spec(params["b"]),
            _full_spec(params["w1"]),
            _full_spec(params["b1"]),
            _full_spec(params["w2"]),
            _full_spec(params["b2"]),
        ],
        out_specs=pl.BlockSpec((B_TILE, 1), lambda i: (i, 0)),
        scratch_shapes=[pltpu.VMEM((T * B_TILE, 4 * H), jnp.float32)],
    )

    out = pl.pallas_call(
        shutel_kernel,
        out_shape=jax.ShapeDtypeStruct((BP, 1), jnp.float32),
        grid_spec=grid_spec,
        compiler_params=pltpu.CompilerParams(
            dimension_semantics=("parallel",),
            vmem_limit_bytes=vmem_limit),
    )(x_tm, params["wih0_t"], params["wih_t"], params["whh_t"], params["b"],
      params["w1"], params["b1"], params["w2"], params["b2"])
    return out[:B, 0]                             # drop batch padding, squeeze(-1)


# ------------------------------ pure-JAX reference -----------------------------

def reference_forward(x, raw, weight_dtype=jnp.bfloat16):
    """Reference in PyTorch layout and gate order (i, f, g, o); weights rounded
    to the kernel's matmul-operand dtype for a tight comparison."""
    def q(w):
        return w.astype(weight_dtype).astype(jnp.float32)
    L = len(raw["w_hh"])
    H = raw["w_hh"][0].shape[1]
    B, T, _ = x.shape
    seq = x.astype(jnp.float32)
    h = None
    for l in range(L):
        w_ih, w_hh = q(raw["w_ih"][l]), q(raw["w_hh"][l])
        b = raw["b_ih"][l] + raw["b_hh"][l]
        h = jnp.zeros((B, H), jnp.float32)
        c = jnp.zeros((B, H), jnp.float32)
        outs = []
        for t in range(T):
            g = seq[:, t, :] @ w_ih.T + h @ w_hh.T + b
            i = jax.nn.sigmoid(g[:, :H])
            f = jax.nn.sigmoid(g[:, H:2 * H])
            gg = jnp.tanh(g[:, 2 * H:3 * H])
            o = jax.nn.sigmoid(g[:, 3 * H:])
            c = f * c + i * gg
            h = o * jnp.tanh(c)
            outs.append(h)
        seq = jnp.stack(outs, axis=1)
    z1 = h @ q(raw["w1"]).T + raw["b1"]
    z1 = jnp.where(z1 > 0, z1, 0.1 * z1)
    z2 = z1 @ q(raw["w2"]).T + raw["b2"]
    return jax.nn.sigmoid(z2)[:, 0]


if __name__ == "__main__":
    # Small config consistent with the module: hidden_dim=32, lstm_layers=2, dropout=0.0
    B, T, DIN = 2, 8, 6
    HIDDEN_DIM, LSTM_LAYERS = 32, 2

    key = jax.random.PRNGKey(0)
    k_x, k_p = jax.random.split(key)
    x = jax.random.normal(k_x, (B, T, DIN), jnp.float32)
    raw = init_raw_params(k_p, HIDDEN_DIM, LSTM_LAYERS, DIN)
    params = pack_params(raw)

    y = shutel_forward(x, params)
    jax.block_until_ready(y)
    assert y.shape == (B,), y.shape

    y_ref = reference_forward(x, raw)
    np.testing.assert_allclose(np.asarray(y), np.asarray(y_ref), atol=5e-2, rtol=0)
    print("KERNEL_OK")
</pallas_src>

<mosaic_0001>
module attributes {stable_mosaic.version = 11 : i64} {
  func.func @shutel_kernel(%arg0: i32, %arg1: memref<8x8x8xf32, #tpu.memory_space<vmem>>, %arg2: memref<8x128xbf16, #tpu.memory_space<vmem>>, %arg3: memref<1x32x128xbf16, #tpu.memory_space<vmem>>, %arg4: memref<2x32x128xbf16, #tpu.memory_space<vmem>>, %arg5: memref<2x1x128xf32, #tpu.memory_space<vmem>>, %arg6: memref<32x8xbf16, #tpu.memory_space<vmem>>, %arg7: memref<1x8xf32, #tpu.memory_space<vmem>>, %arg8: memref<8x1xbf16, #tpu.memory_space<vmem>>, %arg9: memref<1x1xf32, #tpu.memory_space<vmem>>, %arg10: memref<8x1xf32, #tpu.memory_space<vmem>>, %arg11: memref<64x128xf32, #tpu.memory_space<vmem>>) attributes {dimension_semantics = [#tpu.dimension_semantics<parallel>], iteration_bounds = array<i64: 1>, scalar_prefetch = 0 : i64, scratch_operands = 1 : i64, tpu.core_type = #tpu.core_type<tc>, window_params = [{transform_indices = @transform_0, window_bounds = array<i64: 8, 8, 8>}, {pipeline_mode = #tpu.pipeline_mode<synchronous>, transform_indices = @transform_1, window_bounds = array<i64: 8, 128>}, {pipeline_mode = #tpu.pipeline_mode<synchronous>, transform_indices = @transform_2, window_bounds = array<i64: 1, 32, 128>}, {pipeline_mode = #tpu.pipeline_mode<synchronous>, transform_indices = @transform_3, window_bounds = array<i64: 2, 32, 128>}, {pipeline_mode = #tpu.pipeline_mode<synchronous>, transform_indices = @transform_4, window_bounds = array<i64: 2, 1, 128>}, {pipeline_mode = #tpu.pipeline_mode<synchronous>, transform_indices = @transform_5, window_bounds = array<i64: 32, 8>}, {pipeline_mode = #tpu.pipeline_mode<synchronous>, transform_indices = @transform_6, window_bounds = array<i64: 1, 8>}, {pipeline_mode = #tpu.pipeline_mode<synchronous>, transform_indices = @transform_7, window_bounds = array<i64: 8, 1>}, {pipeline_mode = #tpu.pipeline_mode<synchronous>, transform_indices = @transform_8, window_bounds = array<i64: 1, 1>}, {transform_indices = @transform_9, window_bounds = array<i64: 8, 1>}]} {
    %c0 = arith.constant 0 : index
    %c0_0 = arith.constant 0 : index
    %0 = vector.load %arg2[%c0, %c0_0] : memref<8x128xbf16, #tpu.memory_space<vmem>>, vector<8x128xbf16>
    %c0_1 = arith.constant 0 : index
    %c0_2 = arith.constant 0 : index
    %c0_3 = arith.constant 0 : index
    %1 = vector.load %arg5[%c0_1, %c0_2, %c0_3] : memref<2x1x128xf32, #tpu.memory_space<vmem>>, vector<1x1x128xf32>
    %2 = vector.shape_cast %1 : vector<1x1x128xf32> to vector<1x128xf32>
    %c0_4 = arith.constant 0 : index
    %c0_5 = arith.constant 0 : index
    %c0_6 = arith.constant 0 : index
    %3 = vector.load %arg1[%c0_4, %c0_5, %c0_6] : memref<8x8x8xf32, #tpu.memory_space<vmem>>, vector<1x8x8xf32>
    %4 = vector.shape_cast %3 : vector<1x8x8xf32> to vector<8x8xf32>
    %5 = arith.truncf %4 : vector<8x8xf32> to vector<8x8xbf16>
    %cst = arith.constant dense<0.000000e+00> : vector<8x128xf32>
    %6 = tpu.matmul %5, %0, %cst {dimension_numbers = #tpu.dot_dimension_numbers<[1], [0], [0], [1], [0, 0, 1, 1], [], []>} : vector<8x8xbf16>, vector<8x128xbf16>, vector<8x128xf32> -> vector<8x128xf32>
    %7 = vector.broadcast %2 : vector<1x128xf32> to vector<8x128xf32>
    %8 = arith.addf %6, %7 : vector<8x128xf32>
    %c0_7 = arith.constant 0 : index
    %c0_8 = arith.constant 0 : index
    %9 = vector.load %arg11[%c0_7, %c0_8] : memref<64x128xf32, #tpu.memory_space<vmem>>, vector<8x128xf32>
    tpu.vector_store %arg11[%c0_7, %c0_8], %8 {strides = array<i32>} : memref<64x128xf32, #tpu.memory_space<vmem>>, vector<8x128xf32>,
    %c1 = arith.constant 1 : index
    %c0_9 = arith.constant 0 : index
    %c0_10 = arith.constant 0 : index
    %10 = vector.load %arg1[%c1, %c0_9, %c0_10] : memref<8x8x8xf32, #tpu.memory_space<vmem>>, vector<1x8x8xf32>
    %11 = vector.shape_cast %10 : vector<1x8x8xf32> to vector<8x8xf32>
    %12 = arith.truncf %11 : vector<8x8xf32> to vector<8x8xbf16>
    %cst_11 = arith.constant dense<0.000000e+00> : vector<8x128xf32>
    %13 = tpu.matmul %12, %0, %cst_11 {dimension_numbers = #tpu.dot_dimension_numbers<[1], [0], [0], [1], [0, 0, 1, 1], [], []>} : vector<8x8xbf16>, vector<8x128xbf16>, vector<8x128xf32> -> vector<8x128xf32>
    %14 = vector.broadcast %2 : vector<1x128xf32> to vector<8x128xf32>
    %15 = arith.addf %13, %14 : vector<8x128xf32>
    %c8 = arith.constant 8 : index
    %c0_12 = arith.constant 0 : index
    %16 = vector.load %arg11[%c8, %c0_12] : memref<64x128xf32, #tpu.memory_space<vmem>>, vector<8x128xf32>
    tpu.vector_store %arg11[%c8, %c0_12], %15 {strides = array<i32>} : memref<64x128xf32, #tpu.memory_space<vmem>>, vector<8x128xf32>,
    %c2 = arith.constant 2 : index
    %c0_13 = arith.constant 0 : index
    %c0_14 = arith.constant 0 : index
    %17 = vector.load %arg1[%c2, %c0_13, %c0_14] : memref<8x8x8xf32, #tpu.memory_space<vmem>>, vector<1x8x8xf32>
    %18 = vector.shape_cast %17 : vector<1x8x8xf32> to vector<8x8xf32>
    %19 = arith.truncf %18 : vector<8x8xf32> to vector<8x8xbf16>
    %cst_15 = arith.constant dense<0.000000e+00> : vector<8x128xf32>
    %20 = tpu.matmul %19, %0, %cst_15 {dimension_numbers = #tpu.dot_dimension_numbers<[1], [0], [0], [1], [0, 0, 1, 1], [], []>} : vector<8x8xbf16>, vector<8x128xbf16>, vector<8x128xf32> -> vector<8x128xf32>
    %21 = vector.broadcast %2 : vector<1x128xf32> to vector<8x128xf32>
    %22 = arith.addf %20, %21 : vector<8x128xf32>
    %c16 = arith.constant 16 : index
    %c0_16 = arith.constant 0 : index
    %23 = vector.load %arg11[%c16, %c0_16] : memref<64x128xf32, #tpu.memory_space<vmem>>, vector<8x128xf32>
    tpu.vector_store %arg11[%c16, %c0_16], %22 {strides = array<i32>} : memref<64x128xf32, #tpu.memory_space<vmem>>, vector<8x128xf32>,
    %c3 = arith.constant 3 : index
    %c0_17 = arith.constant 0 : index
    %c0_18 = arith.constant 0 : index
    %24 = vector.load %arg1[%c3, %c0_17, %c0_18] : memref<8x8x8xf32, #tpu.memory_space<vmem>>, vector<1x8x8xf32>
    %25 = vector.shape_cast %24 : vector<1x8x8xf32> to vector<8x8xf32>
    %26 = arith.truncf %25 : vector<8x8xf32> to vector<8x8xbf16>
    %cst_19 = arith.constant dense<0.000000e+00> : vector<8x128xf32>
    %27 = tpu.matmul %26, %0, %cst_19 {dimension_numbers = #tpu.dot_dimension_numbers<[1], [0], [0], [1], [0, 0, 1, 1], [], []>} : vector<8x8xbf16>, vector<8x128xbf16>, vector<8x128xf32> -> vector<8x128xf32>
    %28 = vector.broadcast %2 : vector<1x128xf32> to vector<8x128xf32>
    %29 = arith.addf %27, %28 : vector<8x128xf32>
    %c24 = arith.constant 24 : index
    %c0_20 = arith.constant 0 : index
    %30 = vector.load %arg11[%c24, %c0_20] : memref<64x128xf32, #tpu.memory_space<vmem>>, vector<8x128xf32>
    tpu.vector_store %arg11[%c24, %c0_20], %29 {strides = array<i32>} : memref<64x128xf32, #tpu.memory_space<vmem>>, vector<8x128xf32>,
    %c4 = arith.constant 4 : index
    %c0_21 = arith.constant 0 : index
    %c0_22 = arith.constant 0 : index
    %31 = vector.load %arg1[%c4, %c0_21, %c0_22] : memref<8x8x8xf32, #tpu.memory_space<vmem>>, vector<1x8x8xf32>
    %32 = vector.shape_cast %31 : vector<1x8x8xf32> to vector<8x8xf32>
    %33 = arith.truncf %32 : vector<8x8xf32> to vector<8x8xbf16>
    %cst_23 = arith.constant dense<0.000000e+00> : vector<8x128xf32>
    %34 = tpu.matmul %33, %0, %cst_23 {dimension_numbers = #tpu.dot_dimension_numbers<[1], [0], [0], [1], [0, 0, 1, 1], [], []>} : vector<8x8xbf16>, vector<8x128xbf16>, vector<8x128xf32> -> vector<8x128xf32>
    %35 = vector.broadcast %2 : vector<1x128xf32> to vector<8x128xf32>
    %36 = arith.addf %34, %35 : vector<8x128xf32>
    %c32 = arith.constant 32 : index
    %c0_24 = arith.constant 0 : index
    %37 = vector.load %arg11[%c32, %c0_24] : memref<64x128xf32, #tpu.memory_space<vmem>>, vector<8x128xf32>
    tpu.vector_store %arg11[%c32, %c0_24], %36 {strides = array<i32>} : memref<64x128xf32, #tpu.memory_space<vmem>>, vector<8x128xf32>,
    %c5 = arith.constant 5 : index
    %c0_25 = arith.constant 0 : index
    %c0_26 = arith.constant 0 : index
    %38 = vector.load %arg1[%c5, %c0_25, %c0_26] : memref<8x8x8xf32, #tpu.memory_space<vmem>>, vector<1x8x8xf32>
    %39 = vector.shape_cast %38 : vector<1x8x8xf32> to vector<8x8xf32>
    %40 = arith.truncf %39 : vector<8x8xf32> to vector<8x8xbf16>
    %cst_27 = arith.constant dense<0.000000e+00> : vector<8x128xf32>
    %41 = tpu.matmul %40, %0, %cst_27 {dimension_numbers = #tpu.dot_dimension_numbers<[1], [0], [0], [1], [0, 0, 1, 1], [], []>} : vector<8x8xbf16>, vector<8x128xbf16>, vector<8x128xf32> -> vector<8x128xf32>
    %42 = vector.broadcast %2 : vector<1x128xf32> to vector<8x128xf32>
    %43 = arith.addf %41, %42 : vector<8x128xf32>
    %c40 = arith.constant 40 : index
    %c0_28 = arith.constant 0 : index
    %44 = vector.load %arg11[%c40, %c0_28] : memref<64x128xf32, #tpu.memory_space<vmem>>, vector<8x128xf32>
    tpu.vector_store %arg11[%c40, %c0_28], %43 {strides = array<i32>} : memref<64x128xf32, #tpu.memory_space<vmem>>, vector<8x128xf32>,
    %c6 = arith.constant 6 : index
    %c0_29 = arith.constant 0 : index
    %c0_30 = arith.constant 0 : index
    %45 = vector.load %arg1[%c6, %c0_29, %c0_30] : memref<8x8x8xf32, #tpu.memory_space<vmem>>, vector<1x8x8xf32>
    %46 = vector.shape_cast %45 : vector<1x8x8xf32> to vector<8x8xf32>
    %47 = arith.truncf %46 : vector<8x8xf32> to vector<8x8xbf16>
    %cst_31 = arith.constant dense<0.000000e+00> : vector<8x128xf32>
    %48 = tpu.matmul %47, %0, %cst_31 {dimension_numbers = #tpu.dot_dimension_numbers<[1], [0], [0], [1], [0, 0, 1, 1], [], []>} : vector<8x8xbf16>, vector<8x128xbf16>, vector<8x128xf32> -> vector<8x128xf32>
    %49 = vector.broadcast %2 : vector<1x128xf32> to vector<8x128xf32>
    %50 = arith.addf %48, %49 : vector<8x128xf32>
    %c48 = arith.constant 48 : index
    %c0_32 = arith.constant 0 : index
    %51 = vector.load %arg11[%c48, %c0_32] : memref<64x128xf32, #tpu.memory_space<vmem>>, vector<8x128xf32>
    tpu.vector_store %arg11[%c48, %c0_32], %50 {strides = array<i32>} : memref<64x128xf32, #tpu.memory_space<vmem>>, vector<8x128xf32>,
    %c7 = arith.constant 7 : index
    %c0_33 = arith.constant 0 : index
    %c0_34 = arith.constant 0 : index
    %52 = vector.load %arg1[%c7, %c0_33, %c0_34] : memref<8x8x8xf32, #tpu.memory_space<vmem>>, vector<1x8x8xf32>
    %53 = vector.shape_cast %52 : vector<1x8x8xf32> to vector<8x8xf32>
    %54 = arith.truncf %53 : vector<8x8xf32> to vector<8x8xbf16>
    %cst_35 = arith.constant dense<0.000000e+00> : vector<8x128xf32>
    %55 = tpu.matmul %54, %0, %cst_35 {dimension_numbers = #tpu.dot_dimension_numbers<[1], [0], [0], [1], [0, 0, 1, 1], [], []>} : vector<8x8xbf16>, vector<8x128xbf16>, vector<8x128xf32> -> vector<8x128xf32>
    %56 = vector.broadcast %2 : vector<1x128xf32> to vector<8x128xf32>
    %57 = arith.addf %55, %56 : vector<8x128xf32>
    %c56 = arith.constant 56 : index
    %c0_36 = arith.constant 0 : index
    %58 = vector.load %arg11[%c56, %c0_36] : memref<64x128xf32, #tpu.memory_space<vmem>>, vector<8x128xf32>
    tpu.vector_store %arg11[%c56, %c0_36], %57 {strides = array<i32>} : memref<64x128xf32, #tpu.memory_space<vmem>>, vector<8x128xf32>,
    %c0_37 = arith.constant 0 : index
    %c0_38 = arith.constant 0 : index
    %c0_39 = arith.constant 0 : index
    %59 = vector.load %arg4[%c0_37, %c0_38, %c0_39] : memref<2x32x128xbf16, #tpu.memory_space<vmem>>, vector<1x32x128xbf16>
    %60 = vector.shape_cast %59 : vector<1x32x128xbf16> to vector<32x128xbf16>
    %c0_40 = arith.constant 0 : index
    %c0_41 = arith.constant 0 : index
    %c0_42 = arith.constant 0 : index
    %61 = vector.load %arg3[%c0_40, %c0_41, %c0_42] : memref<1x32x128xbf16, #tpu.memory_space<vmem>>, vector<1x32x128xbf16>
    %62 = vector.shape_cast %61 : vector<1x32x128xbf16> to vector<32x128xbf16>
    %c1_43 = arith.constant 1 : index
    %c0_44 = arith.constant 0 : index
    %c0_45 = arith.constant 0 : index
    %63 = vector.load %arg5[%c1_43, %c0_44, %c0_45] : memref<2x1x128xf32, #tpu.memory_space<vmem>>, vector<1x1x128xf32>
    %64 = vector.shape_cast %63 : vector<1x1x128xf32> to vector<1x128xf32>
    %cst_46 = arith.constant 0.000000e+00 : f32
    %65 = vector.broadcast %cst_46 : f32 to vector<8x32xf32>
    %cst_47 = arith.constant 0.000000e+00 : f32
    %66 = vector.broadcast %cst_47 : f32 to vector<8x32xf32>
    %c0_48 = arith.constant 0 : index
    %c0_49 = arith.constant 0 : index
    %67 = vector.load %arg11[%c0_48, %c0_49] : memref<64x128xf32, #tpu.memory_space<vmem>>, vector<8x128xf32>
    %68 = arith.truncf %65 : vector<8x32xf32> to vector<8x32xbf16>
    %cst_50 = arith.constant dense<0.000000e+00> : vector<8x128xf32>
    %69 = tpu.matmul %68, %60, %cst_50 {dimension_numbers = #tpu.dot_dimension_numbers<[1], [0], [0], [1], [0, 0, 1, 1], [], []>} : vector<8x32xbf16>, vector<32x128xbf16>, vector<8x128xf32> -> vector<8x128xf32>
    %70 = arith.addf %67, %69 : vector<8x128xf32>
    %71 = math.tanh %70 : vector<8x128xf32>
    %72 = vector.extract_strided_slice %71 {offsets = [0, 0], sizes = [8, 96], strides = [1, 1]} : vector<8x128xf32> to vector<8x96xf32>
    %cst_51 = arith.constant 5.000000e-01 : f32
    %73 = vector.broadcast %cst_51 : f32 to vector<8x96xf32>
    %74 = arith.mulf %73, %72 : vector<8x96xf32>
    %cst_52 = arith.constant 5.000000e-01 : f32
    %75 = vector.broadcast %cst_52 : f32 to vector<8x96xf32>
    %76 = arith.addf %74, %75 : vector<8x96xf32>
    %77 = vector.extract_strided_slice %71 {offsets = [0, 96], sizes = [8, 32], strides = [1, 1]} : vector<8x128xf32> to vector<8x32xf32>
    %78 = vector.extract_strided_slice %76 {offsets = [0, 32], sizes = [8, 32], strides = [1, 1]} : vector<8x96xf32> to vector<8x32xf32>
    %79 = arith.mulf %78, %66 : vector<8x32xf32>
    %80 = vector.extract_strided_slice %76 {offsets = [0, 0], sizes = [8, 32], strides = [1, 1]} : vector<8x96xf32> to vector<8x32xf32>
    %81 = arith.mulf %80, %77 : vector<8x32xf32>
    %82 = arith.addf %79, %81 : vector<8x32xf32>
    %83 = vector.extract_strided_slice %76 {offsets = [0, 64], sizes = [8, 32], strides = [1, 1]} : vector<8x96xf32> to vector<8x32xf32>
    %84 = math.tanh %82 : vector<8x32xf32>
    %85 = arith.mulf %83, %84 : vector<8x32xf32>
    %86 = arith.truncf %85 : vector<8x32xf32> to vector<8x32xbf16>
    %cst_53 = arith.constant dense<0.000000e+00> : vector<8x128xf32>
    %87 = tpu.matmul %86, %62, %cst_53 {dimension_numbers = #tpu.dot_dimension_numbers<[1], [0], [0], [1], [0, 0, 1, 1], [], []>} : vector<8x32xbf16>, vector<32x128xbf16>, vector<8x128xf32> -> vector<8x128xf32>
    %88 = vector.broadcast %64 : vector<1x128xf32> to vector<8x128xf32>
    %89 = arith.addf %87, %88 : vector<8x128xf32>
    %c0_54 = arith.constant 0 : index
    %c0_55 = arith.constant 0 : index
    %90 = vector.load %arg11[%c0_54, %c0_55] : memref<64x128xf32, #tpu.memory_space<vmem>>, vector<8x128xf32>
    tpu.vector_store %arg11[%c0_54, %c0_55], %89 {strides = array<i32>} : memref<64x128xf32, #tpu.memory_space<vmem>>, vector<8x128xf32>,
    %c8_56 = arith.constant 8 : index
    %c0_57 = arith.constant 0 : index
    %91 = vector.load %arg11[%c8_56, %c0_57] : memref<64x128xf32, #tpu.memory_space<vmem>>, vector<8x128xf32>
    %92 = arith.truncf %85 : vector<8x32xf32> to vector<8x32xbf16>
    %cst_58 = arith.constant dense<0.000000e+00> : vector<8x128xf32>
    %93 = tpu.matmul %92, %60, %cst_58 {dimension_numbers = #tpu.dot_dimension_numbers<[1], [0], [0], [1], [0, 0, 1, 1], [], []>} : vector<8x32xbf16>, vector<32x128xbf16>, vector<8x128xf32> -> vector<8x128xf32>
    %94 = arith.addf %91, %93 : vector<8x128xf32>
    %95 = math.tanh %94 : vector<8x128xf32>
    %96 = vector.extract_strided_slice %95 {offsets = [0, 0], sizes = [8, 96], strides = [1, 1]} : vector<8x128xf32> to vector<8x96xf32>
    %cst_59 = arith.constant 5.000000e-01 : f32
    %97 = vector.broadcast %cst_59 : f32 to vector<8x96xf32>
    %98 = arith.mulf %97, %96 : vector<8x96xf32>
    %cst_60 = arith.constant 5.000000e-01 : f32
    %99 = vector.broadcast %cst_60 : f32 to vector<8x96xf32>
    %100 = arith.addf %98, %99 : vector<8x96xf32>
    %101 = vector.extract_strided_slice %95 {offsets = [0, 96], sizes = [8, 32], strides = [1, 1]} : vector<8x128xf32> to vector<8x32xf32>
    %102 = vector.extract_strided_slice %100 {offsets = [0, 32], sizes = [8, 32], strides = [1, 1]} : vector<8x96xf32> to vector<8x32xf32>
    %103 = arith.mulf %102, %82 : vector<8x32xf32>
    %104 = vector.extract_strided_slice %100 {offsets = [0, 0], sizes = [8, 32], strides = [1, 1]} : vector<8x96xf32> to vector<8x32xf32>
    %105 = arith.mulf %104, %101 : vector<8x32xf32>
    %106 = arith.addf %103, %105 : vector<8x32xf32>
    %107 = vector.extract_strided_slice %100 {offsets = [0, 64], sizes = [8, 32], strides = [1, 1]} : vector<8x96xf32> to vector<8x32xf32>
    %108 = math.tanh %106 : vector<8x32xf32>
    %109 = arith.mulf %107, %108 : vector<8x32xf32>
    %110 = arith.truncf %109 : vector<8x32xf32> to vector<8x32xbf16>
    %cst_61 = arith.constant dense<0.000000e+00> : vector<8x128xf32>
    %111 = tpu.matmul %110, %62, %cst_61 {dimension_numbers = #tpu.dot_dimension_numbers<[1], [0], [0], [1], [0, 0, 1, 1], [], []>} : vector<8x32xbf16>, vector<32x128xbf16>, vector<8x128xf32> -> vector<8x128xf32>
    %112 = vector.broadcast %64 : vector<1x128xf32> to vector<8x128xf32>
    %113 = arith.addf %111, %112 : vector<8x128xf32>
    %c8_62 = arith.constant 8 : index
    %c0_63 = arith.constant 0 : index
    %114 = vector.load %arg11[%c8_62, %c0_63] : memref<64x128xf32, #tpu.memory_space<vmem>>, vector<8x128xf32>
    tpu.vector_store %arg11[%c8_62, %c0_63], %113 {strides = array<i32>} : memref<64x128xf32, #tpu.memory_space<vmem>>, vector<8x128xf32>,
    %c16_64 = arith.constant 16 : index
    %c0_65 = arith.constant 0 : index
    %115 = vector.load %arg11[%c16_64, %c0_65] : memref<64x128xf32, #tpu.memory_space<vmem>>, vector<8x128xf32>
    %116 = arith.truncf %109 : vector<8x32xf32> to vector<8x32xbf16>
    %cst_66 = arith.constant dense<0.000000e+00> : vector<8x128xf32>
    %117 = tpu.matmul %116, %60, %cst_66 {dimension_numbers = #tpu.dot_dimension_numbers<[1], [0], [0], [1], [0, 0, 1, 1], [], []>} : vector<8x32xbf16>, vector<32x128xbf16>, vector<8x128xf32> -> vector<8x128xf32>
    %118 = arith.addf %115, %117 : vector<8x128xf32>
    %119 = math.tanh %118 : vector<8x128xf32>
    %120 = vector.extract_strided_slice %119 {offsets = [0, 0], sizes = [8, 96], strides = [1, 1]} : vector<8x128xf32> to vector<8x96xf32>
    %cst_67 = arith.constant 5.000000e-01 : f32
    %121 = vector.broadcast %cst_67 : f32 to vector<8x96xf32>
    %122 = arith.mulf %121, %120 : vector<8x96xf32>
    %cst_68 = arith.constant 5.000000e-01 : f32
    %123 = vector.broadcast %cst_68 : f32 to vector<8x96xf32>
    %124 = arith.addf %122, %123 : vector<8x96xf32>
    %125 = vector.extract_strided_slice %119 {offsets = [0, 96], sizes = [8, 32], strides = [1, 1]} : vector<8x128xf32> to vector<8x32xf32>
    %126 = vector.extract_strided_slice %124 {offsets = [0, 32], sizes = [8, 32], strides = [1, 1]} : vector<8x96xf32> to vector<8x32xf32>
    %127 = arith.mulf %126, %106 : vector<8x32xf32>
    %128 = vector.extract_strided_slice %124 {offsets = [0, 0], sizes = [8, 32], strides = [1, 1]} : vector<8x96xf32> to vector<8x32xf32>
    %129 = arith.mulf %128, %125 : vector<8x32xf32>
    %130 = arith.addf %127, %129 : vector<8x32xf32>
    %131 = vector.extract_strided_slice %124 {offsets = [0, 64], sizes = [8, 32], strides = [1, 1]} : vector<8x96xf32> to vector<8x32xf32>
    %132 = math.tanh %130 : vector<8x32xf32>
    %133 = arith.mulf %131, %132 : vector<8x32xf32>
    %134 = arith.truncf %133 : vector<8x32xf32> to vector<8x32xbf16>
    %cst_69 = arith.constant dense<0.000000e+00> : vector<8x128xf32>
    %135 = tpu.matmul %134, %62, %cst_69 {dimension_numbers = #tpu.dot_dimension_numbers<[1], [0], [0], [1], [0, 0, 1, 1], [], []>} : vector<8x32xbf16>, vector<32x128xbf16>, vector<8x128xf32> -> vector<8x128xf32>
    %136 = vector.broadcast %64 : vector<1x128xf32> to vector<8x128xf32>
    %137 = arith.addf %135, %136 : vector<8x128xf32>
    %c16_70 = arith.constant 16 : index
    %c0_71 = arith.constant 0 : index
    %138 = vector.load %arg11[%c16_70, %c0_71] : memref<64x128xf32, #tpu.memory_space<vmem>>, vector<8x128xf32>
    tpu.vector_store %arg11[%c16_70, %c0_71], %137 {strides = array<i32>} : memref<64x128xf32, #tpu.memory_space<vmem>>, vector<8x128xf32>,
    %c24_72 = arith.constant 24 : index
    %c0_73 = arith.constant 0 : index
    %139 = vector.load %arg11[%c24_72, %c0_73] : memref<64x128xf32, #tpu.memory_space<vmem>>, vector<8x128xf32>
    %140 = arith.truncf %133 : vector<8x32xf32> to vector<8x32xbf16>
    %cst_74 = arith.constant dense<0.000000e+00> : vector<8x128xf32>
    %141 = tpu.matmul %140, %60, %cst_74 {dimension_numbers = #tpu.dot_dimension_numbers<[1], [0], [0], [1], [0, 0, 1, 1], [], []>} : vector<8x32xbf16>, vector<32x128xbf16>, vector<8x128xf32> -> vector<8x128xf32>
    %142 = arith.addf %139, %141 : vector<8x128xf32>
    %143 = math.tanh %142 : vector<8x128xf32>
    %144 = vector.extract_strided_slice %143 {offsets = [0, 0], sizes = [8, 96], strides = [1, 1]} : vector<8x128xf32> to vector<8x96xf32>
    %cst_75 = arith.constant 5.000000e-01 : f32
    %145 = vector.broadcast %cst_75 : f32 to vector<8x96xf32>
    %146 = arith.mulf %145, %144 : vector<8x96xf32>
    %cst_76 = arith.constant 5.000000e-01 : f32
    %147 = vector.broadcast %cst_76 : f32 to vector<8x96xf32>
    %148 = arith.addf %146, %147 : vector<8x96xf32>
    %149 = vector.extract_strided_slice %143 {offsets = [0, 96], sizes = [8, 32], strides = [1, 1]} : vector<8x128xf32> to vector<8x32xf32>
    %150 = vector.extract_strided_slice %148 {offsets = [0, 32], sizes = [8, 32], strides = [1, 1]} : vector<8x96xf32> to vector<8x32xf32>
    %151 = arith.mulf %150, %130 : vector<8x32xf32>
    %152 = vector.extract_strided_slice %148 {offsets = [0, 0], sizes = [8, 32], strides = [1, 1]} : vector<8x96xf32> to vector<8x32xf32>
    %153 = arith.mulf %152, %149 : vector<8x32xf32>
    %154 = arith.addf %151, %153 : vector<8x32xf32>
    %155 = vector.extract_strided_slice %148 {offsets = [0, 64], sizes = [8, 32], strides = [1, 1]} : vector<8x96xf32> to vector<8x32xf32>
    %156 = math.tanh %154 : vector<8x32xf32>
    %157 = arith.mulf %155, %156 : vector<8x32xf32>
    %158 = arith.truncf %157 : vector<8x32xf32> to vector<8x32xbf16>
    %cst_77 = arith.constant dense<0.000000e+00> : vector<8x128xf32>
    %159 = tpu.matmul %158, %62, %cst_77 {dimension_numbers = #tpu.dot_dimension_numbers<[1], [0], [0], [1], [0, 0, 1, 1], [], []>} : vector<8x32xbf16>, vector<32x128xbf16>, vector<8x128xf32> -> vector<8x128xf32>
    %160 = vector.broadcast %64 : vector<1x128xf32> to vector<8x128xf32>
    %161 = arith.addf %159, %160 : vector<8x128xf32>
    %c24_78 = arith.constant 24 : index
    %c0_79 = arith.constant 0 : index
    %162 = vector.load %arg11[%c24_78, %c0_79] : memref<64x128xf32, #tpu.memory_space<vmem>>, vector<8x128xf32>
    tpu.vector_store %arg11[%c24_78, %c0_79], %161 {strides = array<i32>} : memref<64x128xf32, #tpu.memory_space<vmem>>, vector<8x128xf32>,
    %c32_80 = arith.constant 32 : index
    %c0_81 = arith.constant 0 : index
    %163 = vector.load %arg11[%c32_80, %c0_81] : memref<64x128xf32, #tpu.memory_space<vmem>>, vector<8x128xf32>
    %164 = arith.truncf %157 : vector<8x32xf32> to vector<8x32xbf16>
    %cst_82 = arith.constant dense<0.000000e+00> : vector<8x128xf32>
    %165 = tpu.matmul %164, %60, %cst_82 {dimension_numbers = #tpu.dot_dimension_numbers<[1], [0], [0], [1], [0, 0, 1, 1], [], []>} : vector<8x32xbf16>, vector<32x128xbf16>, vector<8x128xf32> -> vector<8x128xf32>
    %166 = arith.addf %163, %165 : vector<8x128xf32>
    %167 = math.tanh %166 : vector<8x128xf32>
    %168 = vector.extract_strided_slice %167 {offsets = [0, 0], sizes = [8, 96], strides = [1, 1]} : vector<8x128xf32> to vector<8x96xf32>
    %cst_83 = arith.constant 5.000000e-01 : f32
    %169 = vector.broadcast %cst_83 : f32 to vector<8x96xf32>
    %170 = arith.mulf %169, %168 : vector<8x96xf32>
    %cst_84 = arith.constant 5.000000e-01 : f32
    %171 = vector.broadcast %cst_84 : f32 to vector<8x96xf32>
    %172 = arith.addf %170, %171 : vector<8x96xf32>
    %173 = vector.extract_strided_slice %167 {offsets = [0, 96], sizes = [8, 32], strides = [1, 1]} : vector<8x128xf32> to vector<8x32xf32>
    %174 = vector.extract_strided_slice %172 {offsets = [0, 32], sizes = [8, 32], strides = [1, 1]} : vector<8x96xf32> to vector<8x32xf32>
    %175 = arith.mulf %174, %154 : vector<8x32xf32>
    %176 = vector.extract_strided_slice %172 {offsets = [0, 0], sizes = [8, 32], strides = [1, 1]} : vector<8x96xf32> to vector<8x32xf32>
    %177 = arith.mulf %176, %173 : vector<8x32xf32>
    %178 = arith.addf %175, %177 : vector<8x32xf32>
    %179 = vector.extract_strided_slice %172 {offsets = [0, 64], sizes = [8, 32], strides = [1, 1]} : vector<8x96xf32> to vector<8x32xf32>
    %180 = math.tanh %178 : vector<8x32xf32>
    %181 = arith.mulf %179, %180 : vector<8x32xf32>
    %182 = arith.truncf %181 : vector<8x32xf32> to vector<8x32xbf16>
    %cst_85 = arith.constant dense<0.000000e+00> : vector<8x128xf32>
    %183 = tpu.matmul %182, %62, %cst_85 {dimension_numbers = #tpu.dot_dimension_numbers<[1], [0], [0], [1], [0, 0, 1, 1], [], []>} : vector<8x32xbf16>, vector<32x128xbf16>, vector<8x128xf32> -> vector<8x128xf32>
    %184 = vector.broadcast %64 : vector<1x128xf32> to vector<8x128xf32>
    %185 = arith.addf %183, %184 : vector<8x128xf32>
    %c32_86 = arith.constant 32 : index
    %c0_87 = arith.constant 0 : index
    %186 = vector.load %arg11[%c32_86, %c0_87] : memref<64x128xf32, #tpu.memory_space<vmem>>, vector<8x128xf32>
    tpu.vector_store %arg11[%c32_86, %c0_87], %185 {strides = array<i32>} : memref<64x128xf32, #tpu.memory_space<vmem>>, vector<8x128xf32>,
    %c40_88 = arith.constant 40 : index
    %c0_89 = arith.constant 0 : index
    %187 = vector.load %arg11[%c40_88, %c0_89] : memref<64x128xf32, #tpu.memory_space<vmem>>, vector<8x128xf32>
    %188 = arith.truncf %181 : vector<8x32xf32> to vector<8x32xbf16>
    %cst_90 = arith.constant dense<0.000000e+00> : vector<8x128xf32>
    %189 = tpu.matmul %188, %60, %cst_90 {dimension_numbers = #tpu.dot_dimension_numbers<[1], [0], [0], [1], [0, 0, 1, 1], [], []>} : vector<8x32xbf16>, vector<32x128xbf16>, vector<8x128xf32> -> vector<8x128xf32>
    %190 = arith.addf %187, %189 : vector<8x128xf32>
    %191 = math.tanh %190 : vector<8x128xf32>
    %192 = vector.extract_strided_slice %191 {offsets = [0, 0], sizes = [8, 96], strides = [1, 1]} : vector<8x128xf32> to vector<8x96xf32>
    %cst_91 = arith.constant 5.000000e-01 : f32
    %193 = vector.broadcast %cst_91 : f32 to vector<8x96xf32>
    %194 = arith.mulf %193, %192 : vector<8x96xf32>
    %cst_92 = arith.constant 5.000000e-01 : f32
    %195 = vector.broadcast %cst_92 : f32 to vector<8x96xf32>
    %196 = arith.addf %194, %195 : vector<8x96xf32>
    %197 = vector.extract_strided_slice %191 {offsets = [0, 96], sizes = [8, 32], strides = [1, 1]} : vector<8x128xf32> to vector<8x32xf32>
    %198 = vector.extract_strided_slice %196 {offsets = [0, 32], sizes = [8, 32], strides = [1, 1]} : vector<8x96xf32> to vector<8x32xf32>
    %199 = arith.mulf %198, %178 : vector<8x32xf32>
    %200 = vector.extract_strided_slice %196 {offsets = [0, 0], sizes = [8, 32], strides = [1, 1]} : vector<8x96xf32> to vector<8x32xf32>
    %201 = arith.mulf %200, %197 : vector<8x32xf32>
    %202 = arith.addf %199, %201 : vector<8x32xf32>
    %203 = vector.extract_strided_slice %196 {offsets = [0, 64], sizes = [8, 32], strides = [1, 1]} : vector<8x96xf32> to vector<8x32xf32>
    %204 = math.tanh %202 : vector<8x32xf32>
    %205 = arith.mulf %203, %204 : vector<8x32xf32>
    %206 = arith.truncf %205 : vector<8x32xf32> to vector<8x32xbf16>
    %cst_93 = arith.constant dense<0.000000e+00> : vector<8x128xf32>
    %207 = tpu.matmul %206, %62, %cst_93 {dimension_numbers = #tpu.dot_dimension_numbers<[1], [0], [0], [1], [0, 0, 1, 1], [], []>} : vector<8x32xbf16>, vector<32x128xbf16>, vector<8x128xf32> -> vector<8x128xf32>
    %208 = vector.broadcast %64 : vector<1x128xf32> to vector<8x128xf32>
    %209 = arith.addf %207, %208 : vector<8x128xf32>
    %c40_94 = arith.constant 40 : index
    %c0_95 = arith.constant 0 : index
    %210 = vector.load %arg11[%c40_94, %c0_95] : memref<64x128xf32, #tpu.memory_space<vmem>>, vector<8x128xf32>
    tpu.vector_store %arg11[%c40_94, %c0_95], %209 {strides = array<i32>} : memref<64x128xf32, #tpu.memory_space<vmem>>, vector<8x128xf32>,
    %c48_96 = arith.constant 48 : index
    %c0_97 = arith.constant 0 : index
    %211 = vector.load %arg11[%c48_96, %c0_97] : memref<64x128xf32, #tpu.memory_space<vmem>>, vector<8x128xf32>
    %212 = arith.truncf %205 : vector<8x32xf32> to vector<8x32xbf16>
    %cst_98 = arith.constant dense<0.000000e+00> : vector<8x128xf32>
    %213 = tpu.matmul %212, %60, %cst_98 {dimension_numbers = #tpu.dot_dimension_numbers<[1], [0], [0], [1], [0, 0, 1, 1], [], []>} : vector<8x32xbf16>, vector<32x128xbf16>, vector<8x128xf32> -> vector<8x128xf32>
    %214 = arith.addf %211, %213 : vector<8x128xf32>
    %215 = math.tanh %214 : vector<8x128xf32>
    %216 = vector.extract_strided_slice %215 {offsets = [0, 0], sizes = [8, 96], strides = [1, 1]} : vector<8x128xf32> to vector<8x96xf32>
    %cst_99 = arith.constant 5.000000e-01 : f32
    %217 = vector.broadcast %cst_99 : f32 to vector<8x96xf32>
    %218 = arith.mulf %217, %216 : vector<8x96xf32>
    %cst_100 = arith.constant 5.000000e-01 : f32
    %219 = vector.broadcast %cst_100 : f32 to vector<8x96xf32>
    %220 = arith.addf %218, %219 : vector<8x96xf32>
    %221 = vector.extract_strided_slice %215 {offsets = [0, 96], sizes = [8, 32], strides = [1, 1]} : vector<8x128xf32> to vector<8x32xf32>
    %222 = vector.extract_strided_slice %220 {offsets = [0, 32], sizes = [8, 32], strides = [1, 1]} : vector<8x96xf32> to vector<8x32xf32>
    %223 = arith.mulf %222, %202 : vector<8x32xf32>
    %224 = vector.extract_strided_slice %220 {offsets = [0, 0], sizes = [8, 32], strides = [1, 1]} : vector<8x96xf32> to vector<8x32xf32>
    %225 = arith.mulf %224, %221 : vector<8x32xf32>
    %226 = arith.addf %223, %225 : vector<8x32xf32>
    %227 = vector.extract_strided_slice %220 {offsets = [0, 64], sizes = [8, 32], strides = [1, 1]} : vector<8x96xf32> to vector<8x32xf32>
    %228 = math.tanh %226 : vector<8x32xf32>
    %229 = arith.mulf %227, %228 : vector<8x32xf32>
    %230 = arith.truncf %229 : vector<8x32xf32> to vector<8x32xbf16>
    %cst_101 = arith.constant dense<0.000000e+00> : vector<8x128xf32>
    %231 = tpu.matmul %230, %62, %cst_101 {dimension_numbers = #tpu.dot_dimension_numbers<[1], [0], [0], [1], [0, 0, 1, 1], [], []>} : vector<8x32xbf16>, vector<32x128xbf16>, vector<8x128xf32> -> vector<8x128xf32>
    %232 = vector.broadcast %64 : vector<1x128xf32> to vector<8x128xf32>
    %233 = arith.addf %231, %232 : vector<8x128xf32>
    %c48_102 = arith.constant 48 : index
    %c0_103 = arith.constant 0 : index
    %234 = vector.load %arg11[%c48_102, %c0_103] : memref<64x128xf32, #tpu.memory_space<vmem>>, vector<8x128xf32>
    tpu.vector_store %arg11[%c48_102, %c0_103], %233 {strides = array<i32>} : memref<64x128xf32, #tpu.memory_space<vmem>>, vector<8x128xf32>,
    %c56_104 = arith.constant 56 : index
    %c0_105 = arith.constant 0 : index
    %235 = vector.load %arg11[%c56_104, %c0_105] : memref<64x128xf32, #tpu.memory_space<vmem>>, vector<8x128xf32>
    %236 = arith.truncf %229 : vector<8x32xf32> to vector<8x32xbf16>
    %cst_106 = arith.constant dense<0.000000e+00> : vector<8x128xf32>
    %237 = tpu.matmul %236, %60, %cst_106 {dimension_numbers = #tpu.dot_dimension_numbers<[1], [0], [0], [1], [0, 0, 1, 1], [], []>} : vector<8x32xbf16>, vector<32x128xbf16>, vector<8x128xf32> -> vector<8x128xf32>
    %238 = arith.addf %235, %237 : vector<8x128xf32>
    %239 = math.tanh %238 : vector<8x128xf32>
    %240 = vector.extract_strided_slice %239 {offsets = [0, 0], sizes = [8, 96], strides = [1, 1]} : vector<8x128xf32> to vector<8x96xf32>
    %cst_107 = arith.constant 5.000000e-01 : f32
    %241 = vector.broadcast %cst_107 : f32 to vector<8x96xf32>
    %242 = arith.mulf %241, %240 : vector<8x96xf32>
    %cst_108 = arith.constant 5.000000e-01 : f32
    %243 = vector.broadcast %cst_108 : f32 to vector<8x96xf32>
    %244 = arith.addf %242, %243 : vector<8x96xf32>
    %245 = vector.extract_strided_slice %239 {offsets = [0, 96], sizes = [8, 32], strides = [1, 1]} : vector<8x128xf32> to vector<8x32xf32>
    %246 = vector.extract_strided_slice %244 {offsets = [0, 32], sizes = [8, 32], strides = [1, 1]} : vector<8x96xf32> to vector<8x32xf32>
    %247 = arith.mulf %246, %226 : vector<8x32xf32>
    %248 = vector.extract_strided_slice %244 {offsets = [0, 0], sizes = [8, 32], strides = [1, 1]} : vector<8x96xf32> to vector<8x32xf32>
    %249 = arith.mulf %248, %245 : vector<8x32xf32>
    %250 = arith.addf %247, %249 : vector<8x32xf32>
    %251 = vector.extract_strided_slice %244 {offsets = [0, 64], sizes = [8, 32], strides = [1, 1]} : vector<8x96xf32> to vector<8x32xf32>
    %252 = math.tanh %250 : vector<8x32xf32>
    %253 = arith.mulf %251, %252 : vector<8x32xf32>
    %254 = arith.truncf %253 : vector<8x32xf32> to vector<8x32xbf16>
    %cst_109 = arith.constant dense<0.000000e+00> : vector<8x128xf32>
    %255 = tpu.matmul %254, %62, %cst_109 {dimension_numbers = #tpu.dot_dimension_numbers<[1], [0], [0], [1], [0, 0, 1, 1], [], []>} : vector<8x32xbf16>, vector<32x128xbf16>, vector<8x128xf32> -> vector<8x128xf32>
    %256 = vector.broadcast %64 : vector<1x128xf32> to vector<8x128xf32>
    %257 = arith.addf %255, %256 : vector<8x128xf32>
    %c56_110 = arith.constant 56 : index
    %c0_111 = arith.constant 0 : index
    %258 = vector.load %arg11[%c56_110, %c0_111] : memref<64x128xf32, #tpu.memory_space<vmem>>, vector<8x128xf32>
    tpu.vector_store %arg11[%c56_110, %c0_111], %257 {strides = array<i32>} : memref<64x128xf32, #tpu.memory_space<vmem>>, vector<8x128xf32>,
    %c1_112 = arith.constant 1 : index
    %c0_113 = arith.constant 0 : index
    %c0_114 = arith.constant 0 : index
    %259 = vector.load %arg4[%c1_112, %c0_113, %c0_114] : memref<2x32x128xbf16, #tpu.memory_space<vmem>>, vector<1x32x128xbf16>
    %260 = vector.shape_cast %259 : vector<1x32x128xbf16> to vector<32x128xbf16>
    %cst_115 = arith.constant 0.000000e+00 : f32
    %261 = vector.broadcast %cst_115 : f32 to vector<8x32xf32>
    %cst_116 = arith.constant 0.000000e+00 : f32
    %262 = vector.broadcast %cst_116 : f32 to vector<8x32xf32>
    %c0_117 = arith.constant 0 : index
    %c0_118 = arith.constant 0 : index
    %263 = vector.load %arg11[%c0_117, %c0_118] : memref<64x128xf32, #tpu.memory_space<vmem>>, vector<8x128xf32>
    %264 = arith.truncf %261 : vector<8x32xf32> to vector<8x32xbf16>
    %cst_119 = arith.constant dense<0.000000e+00> : vector<8x128xf32>
    %265 = tpu.matmul %264, %260, %cst_119 {dimension_numbers = #tpu.dot_dimension_numbers<[1], [0], [0], [1], [0, 0, 1, 1], [], []>} : vector<8x32xbf16>, vector<32x128xbf16>, vector<8x128xf32> -> vector<8x128xf32>
    %266 = arith.addf %263, %265 : vector<8x128xf32>
    %267 = math.tanh %266 : vector<8x128xf32>
    %268 = vector.extract_strided_slice %267 {offsets = [0, 0], sizes = [8, 96], strides = [1, 1]} : vector<8x128xf32> to vector<8x96xf32>
    %cst_120 = arith.constant 5.000000e-01 : f32
    %269 = vector.broadcast %cst_120 : f32 to vector<8x96xf32>
    %270 = arith.mulf %269, %268 : vector<8x96xf32>
    %cst_121 = arith.constant 5.000000e-01 : f32
    %271 = vector.broadcast %cst_121 : f32 to vector<8x96xf32>
    %272 = arith.addf %270, %271 : vector<8x96xf32>
    %273 = vector.extract_strided_slice %267 {offsets = [0, 96], sizes = [8, 32], strides = [1, 1]} : vector<8x128xf32> to vector<8x32xf32>
    %274 = vector.extract_strided_slice %272 {offsets = [0, 32], sizes = [8, 32], strides = [1, 1]} : vector<8x96xf32> to vector<8x32xf32>
    %275 = arith.mulf %274, %262 : vector<8x32xf32>
    %276 = vector.extract_strided_slice %272 {offsets = [0, 0], sizes = [8, 32], strides = [1, 1]} : vector<8x96xf32> to vector<8x32xf32>
    %277 = arith.mulf %276, %273 : vector<8x32xf32>
    %278 = arith.addf %275, %277 : vector<8x32xf32>
    %279 = vector.extract_strided_slice %272 {offsets = [0, 64], sizes = [8, 32], strides = [1, 1]} : vector<8x96xf32> to vector<8x32xf32>
    %280 = math.tanh %278 : vector<8x32xf32>
    %281 = arith.mulf %279, %280 : vector<8x32xf32>
    %c8_122 = arith.constant 8 : index
    %c0_123 = arith.constant 0 : index
    %282 = vector.load %arg11[%c8_122, %c0_123] : memref<64x128xf32, #tpu.memory_space<vmem>>, vector<8x128xf32>
    %283 = arith.truncf %281 : vector<8x32xf32> to vector<8x32xbf16>
    %cst_124 = arith.constant dense<0.000000e+00> : vector<8x128xf32>
    %284 = tpu.matmul %283, %260, %cst_124 {dimension_numbers = #tpu.dot_dimension_numbers<[1], [0], [0], [1], [0, 0, 1, 1], [], []>} : vector<8x32xbf16>, vector<32x128xbf16>, vector<8x128xf32> -> vector<8x128xf32>
    %285 = arith.addf %282, %284 : vector<8x128xf32>
    %286 = math.tanh %285 : vector<8x128xf32>
    %287 = vector.extract_strided_slice %286 {offsets = [0, 0], sizes = [8, 96], strides = [1, 1]} : vector<8x128xf32> to vector<8x96xf32>
    %cst_125 = arith.constant 5.000000e-01 : f32
    %288 = vector.broadcast %cst_125 : f32 to vector<8x96xf32>
    %289 = arith.mulf %288, %287 : vector<8x96xf32>
    %cst_126 = arith.constant 5.000000e-01 : f32
    %290 = vector.broadcast %cst_126 : f32 to vector<8x96xf32>
    %291 = arith.addf %289, %290 : vector<8x96xf32>
    %292 = vector.extract_strided_slice %286 {offsets = [0, 96], sizes = [8, 32], strides = [1, 1]} : vector<8x128xf32> to vector<8x32xf32>
    %293 = vector.extract_strided_slice %291 {offsets = [0, 32], sizes = [8, 32], strides = [1, 1]} : vector<8x96xf32> to vector<8x32xf32>
    %294 = arith.mulf %293, %278 : vector<8x32xf32>
    %295 = vector.extract_strided_slice %291 {offsets = [0, 0], sizes = [8, 32], strides = [1, 1]} : vector<8x96xf32> to vector<8x32xf32>
    %296 = arith.mulf %295, %292 : vector<8x32xf32>
    %297 = arith.addf %294, %296 : vector<8x32xf32>
    %298 = vector.extract_strided_slice %291 {offsets = [0, 64], sizes = [8, 32], strides = [1, 1]} : vector<8x96xf32> to vector<8x32xf32>
    %299 = math.tanh %297 : vector<8x32xf32>
    %300 = arith.mulf %298, %299 : vector<8x32xf32>
    %c16_127 = arith.constant 16 : index
    %c0_128 = arith.constant 0 : index
    %301 = vector.load %arg11[%c16_127, %c0_128] : memref<64x128xf32, #tpu.memory_space<vmem>>, vector<8x128xf32>
    %302 = arith.truncf %300 : vector<8x32xf32> to vector<8x32xbf16>
    %cst_129 = arith.constant dense<0.000000e+00> : vector<8x128xf32>
    %303 = tpu.matmul %302, %260, %cst_129 {dimension_numbers = #tpu.dot_dimension_numbers<[1], [0], [0], [1], [0, 0, 1, 1], [], []>} : vector<8x32xbf16>, vector<32x128xbf16>, vector<8x128xf32> -> vector<8x128xf32>
    %304 = arith.addf %301, %303 : vector<8x128xf32>
    %305 = math.tanh %304 : vector<8x128xf32>
    %306 = vector.extract_strided_slice %305 {offsets = [0, 0], sizes = [8, 96], strides = [1, 1]} : vector<8x128xf32> to vector<8x96xf32>
    %cst_130 = arith.constant 5.000000e-01 : f32
    %307 = vector.broadcast %cst_130 : f32 to vector<8x96xf32>
    %308 = arith.mulf %307, %306 : vector<8x96xf32>
    %cst_131 = arith.constant 5.000000e-01 : f32
    %309 = vector.broadcast %cst_131 : f32 to vector<8x96xf32>
    %310 = arith.addf %308, %309 : vector<8x96xf32>
    %311 = vector.extract_strided_slice %305 {offsets = [0, 96], sizes = [8, 32], strides = [1, 1]} : vector<8x128xf32> to vector<8x32xf32>
    %312 = vector.extract_strided_slice %310 {offsets = [0, 32], sizes = [8, 32], strides = [1, 1]} : vector<8x96xf32> to vector<8x32xf32>
    %313 = arith.mulf %312, %297 : vector<8x32xf32>
    %314 = vector.extract_strided_slice %310 {offsets = [0, 0], sizes = [8, 32], strides = [1, 1]} : vector<8x96xf32> to vector<8x32xf32>
    %315 = arith.mulf %314, %311 : vector<8x32xf32>
    %316 = arith.addf %313, %315 : vector<8x32xf32>
    %317 = vector.extract_strided_slice %310 {offsets = [0, 64], sizes = [8, 32], strides = [1, 1]} : vector<8x96xf32> to vector<8x32xf32>
    %318 = math.tanh %316 : vector<8x32xf32>
    %319 = arith.mulf %317, %318 : vector<8x32xf32>
    %c24_132 = arith.constant 24 : index
    %c0_133 = arith.constant 0 : index
    %320 = vector.load %arg11[%c24_132, %c0_133] : memref<64x128xf32, #tpu.memory_space<vmem>>, vector<8x128xf32>
    %321 = arith.truncf %319 : vector<8x32xf32> to vector<8x32xbf16>
    %cst_134 = arith.constant dense<0.000000e+00> : vector<8x128xf32>
    %322 = tpu.matmul %321, %260, %cst_134 {dimension_numbers = #tpu.dot_dimension_numbers<[1], [0], [0], [1], [0, 0, 1, 1], [], []>} : vector<8x32xbf16>, vector<32x128xbf16>, vector<8x128xf32> -> vector<8x128xf32>
    %323 = arith.addf %320, %322 : vector<8x128xf32>
    %324 = math.tanh %323 : vector<8x128xf32>
    %325 = vector.extract_strided_slice %324 {offsets = [0, 0], sizes = [8, 96], strides = [1, 1]} : vector<8x128xf32> to vector<8x96xf32>
    %cst_135 = arith.constant 5.000000e-01 : f32
    %326 = vector.broadcast %cst_135 : f32 to vector<8x96xf32>
    %327 = arith.mulf %326, %325 : vector<8x96xf32>
    %cst_136 = arith.constant 5.000000e-01 : f32
    %328 = vector.broadcast %cst_136 : f32 to vector<8x96xf32>
    %329 = arith.addf %327, %328 : vector<8x96xf32>
    %330 = vector.extract_strided_slice %324 {offsets = [0, 96], sizes = [8, 32], strides = [1, 1]} : vector<8x128xf32> to vector<8x32xf32>
    %331 = vector.extract_strided_slice %329 {offsets = [0, 32], sizes = [8, 32], strides = [1, 1]} : vector<8x96xf32> to vector<8x32xf32>
    %332 = arith.mulf %331, %316 : vector<8x32xf32>
    %333 = vector.extract_strided_slice %329 {offsets = [0, 0], sizes = [8, 32], strides = [1, 1]} : vector<8x96xf32> to vector<8x32xf32>
    %334 = arith.mulf %333, %330 : vector<8x32xf32>
    %335 = arith.addf %332, %334 : vector<8x32xf32>
    %336 = vector.extract_strided_slice %329 {offsets = [0, 64], sizes = [8, 32], strides = [1, 1]} : vector<8x96xf32> to vector<8x32xf32>
    %337 = math.tanh %335 : vector<8x32xf32>
    %338 = arith.mulf %336, %337 : vector<8x32xf32>
    %c32_137 = arith.constant 32 : index
    %c0_138 = arith.constant 0 : index
    %339 = vector.load %arg11[%c32_137, %c0_138] : memref<64x128xf32, #tpu.memory_space<vmem>>, vector<8x128xf32>
    %340 = arith.truncf %338 : vector<8x32xf32> to vector<8x32xbf16>
    %cst_139 = arith.constant dense<0.000000e+00> : vector<8x128xf32>
    %341 = tpu.matmul %340, %260, %cst_139 {dimension_numbers = #tpu.dot_dimension_numbers<[1], [0], [0], [1], [0, 0, 1, 1], [], []>} : vector<8x32xbf16>, vector<32x128xbf16>, vector<8x128xf32> -> vector<8x128xf32>
    %342 = arith.addf %339, %341 : vector<8x128xf32>
    %343 = math.tanh %342 : vector<8x128xf32>
    %344 = vector.extract_strided_slice %343 {offsets = [0, 0], sizes = [8, 96], strides = [1, 1]} : vector<8x128xf32> to vector<8x96xf32>
    %cst_140 = arith.constant 5.000000e-01 : f32
    %345 = vector.broadcast %cst_140 : f32 to vector<8x96xf32>
    %346 = arith.mulf %345, %344 : vector<8x96xf32>
    %cst_141 = arith.constant 5.000000e-01 : f32
    %347 = vector.broadcast %cst_141 : f32 to vector<8x96xf32>
    %348 = arith.addf %346, %347 : vector<8x96xf32>
    %349 = vector.extract_strided_slice %343 {offsets = [0, 96], sizes = [8, 32], strides = [1, 1]} : vector<8x128xf32> to vector<8x32xf32>
    %350 = vector.extract_strided_slice %348 {offsets = [0, 32], sizes = [8, 32], strides = [1, 1]} : vector<8x96xf32> to vector<8x32xf32>
    %351 = arith.mulf %350, %335 : vector<8x32xf32>
    %352 = vector.extract_strided_slice %348 {offsets = [0, 0], sizes = [8, 32], strides = [1, 1]} : vector<8x96xf32> to vector<8x32xf32>
    %353 = arith.mulf %352, %349 : vector<8x32xf32>
    %354 = arith.addf %351, %353 : vector<8x32xf32>
    %355 = vector.extract_strided_slice %348 {offsets = [0, 64], sizes = [8, 32], strides = [1, 1]} : vector<8x96xf32> to vector<8x32xf32>
    %356 = math.tanh %354 : vector<8x32xf32>
    %357 = arith.mulf %355, %356 : vector<8x32xf32>
    %c40_142 = arith.constant 40 : index
    %c0_143 = arith.constant 0 : index
    %358 = vector.load %arg11[%c40_142, %c0_143] : memref<64x128xf32, #tpu.memory_space<vmem>>, vector<8x128xf32>
    %359 = arith.truncf %357 : vector<8x32xf32> to vector<8x32xbf16>
    %cst_144 = arith.constant dense<0.000000e+00> : vector<8x128xf32>
    %360 = tpu.matmul %359, %260, %cst_144 {dimension_numbers = #tpu.dot_dimension_numbers<[1], [0], [0], [1], [0, 0, 1, 1], [], []>} : vector<8x32xbf16>, vector<32x128xbf16>, vector<8x128xf32> -> vector<8x128xf32>
    %361 = arith.addf %358, %360 : vector<8x128xf32>
    %362 = math.tanh %361 : vector<8x128xf32>
    %363 = vector.extract_strided_slice %362 {offsets = [0, 0], sizes = [8, 96], strides = [1, 1]} : vector<8x128xf32> to vector<8x96xf32>
    %cst_145 = arith.constant 5.000000e-01 : f32
    %364 = vector.broadcast %cst_145 : f32 to vector<8x96xf32>
    %365 = arith.mulf %364, %363 : vector<8x96xf32>
    %cst_146 = arith.constant 5.000000e-01 : f32
    %366 = vector.broadcast %cst_146 : f32 to vector<8x96xf32>
    %367 = arith.addf %365, %366 : vector<8x96xf32>
    %368 = vector.extract_strided_slice %362 {offsets = [0, 96], sizes = [8, 32], strides = [1, 1]} : vector<8x128xf32> to vector<8x32xf32>
    %369 = vector.extract_strided_slice %367 {offsets = [0, 32], sizes = [8, 32], strides = [1, 1]} : vector<8x96xf32> to vector<8x32xf32>
    %370 = arith.mulf %369, %354 : vector<8x32xf32>
    %371 = vector.extract_strided_slice %367 {offsets = [0, 0], sizes = [8, 32], strides = [1, 1]} : vector<8x96xf32> to vector<8x32xf32>
    %372 = arith.mulf %371, %368 : vector<8x32xf32>
    %373 = arith.addf %370, %372 : vector<8x32xf32>
    %374 = vector.extract_strided_slice %367 {offsets = [0, 64], sizes = [8, 32], strides = [1, 1]} : vector<8x96xf32> to vector<8x32xf32>
    %375 = math.tanh %373 : vector<8x32xf32>
    %376 = arith.mulf %374, %375 : vector<8x32xf32>
    %c48_147 = arith.constant 48 : index
    %c0_148 = arith.constant 0 : index
    %377 = vector.load %arg11[%c48_147, %c0_148] : memref<64x128xf32, #tpu.memory_space<vmem>>, vector<8x128xf32>
    %378 = arith.truncf %376 : vector<8x32xf32> to vector<8x32xbf16>
    %cst_149 = arith.constant dense<0.000000e+00> : vector<8x128xf32>
    %379 = tpu.matmul %378, %260, %cst_149 {dimension_numbers = #tpu.dot_dimension_numbers<[1], [0], [0], [1], [0, 0, 1, 1], [], []>} : vector<8x32xbf16>, vector<32x128xbf16>, vector<8x128xf32> -> vector<8x128xf32>
    %380 = arith.addf %377, %379 : vector<8x128xf32>
    %381 = math.tanh %380 : vector<8x128xf32>
    %382 = vector.extract_strided_slice %381 {offsets = [0, 0], sizes = [8, 96], strides = [1, 1]} : vector<8x128xf32> to vector<8x96xf32>
    %cst_150 = arith.constant 5.000000e-01 : f32
    %383 = vector.broadcast %cst_150 : f32 to vector<8x96xf32>
    %384 = arith.mulf %383, %382 : vector<8x96xf32>
    %cst_151 = arith.constant 5.000000e-01 : f32
    %385 = vector.broadcast %cst_151 : f32 to vector<8x96xf32>
    %386 = arith.addf %384, %385 : vector<8x96xf32>
    %387 = vector.extract_strided_slice %381 {offsets = [0, 96], sizes = [8, 32], strides = [1, 1]} : vector<8x128xf32> to vector<8x32xf32>
    %388 = vector.extract_strided_slice %386 {offsets = [0, 32], sizes = [8, 32], strides = [1, 1]} : vector<8x96xf32> to vector<8x32xf32>
    %389 = arith.mulf %388, %373 : vector<8x32xf32>
    %390 = vector.extract_strided_slice %386 {offsets = [0, 0], sizes = [8, 32], strides = [1, 1]} : vector<8x96xf32> to vector<8x32xf32>
    %391 = arith.mulf %390, %387 : vector<8x32xf32>
    %392 = arith.addf %389, %391 : vector<8x32xf32>
    %393 = vector.extract_strided_slice %386 {offsets = [0, 64], sizes = [8, 32], strides = [1, 1]} : vector<8x96xf32> to vector<8x32xf32>
    %394 = math.tanh %392 : vector<8x32xf32>
    %395 = arith.mulf %393, %394 : vector<8x32xf32>
    %c56_152 = arith.constant 56 : index
    %c0_153 = arith.constant 0 : index
    %396 = vector.load %arg11[%c56_152, %c0_153] : memref<64x128xf32, #tpu.memory_space<vmem>>, vector<8x128xf32>
    %397 = arith.truncf %395 : vector<8x32xf32> to vector<8x32xbf16>
    %cst_154 = arith.constant dense<0.000000e+00> : vector<8x128xf32>
    %398 = tpu.matmul %397, %260, %cst_154 {dimension_numbers = #tpu.dot_dimension_numbers<[1], [0], [0], [1], [0, 0, 1, 1], [], []>} : vector<8x32xbf16>, vector<32x128xbf16>, vector<8x128xf32> -> vector<8x128xf32>
    %399 = arith.addf %396, %398 : vector<8x128xf32>
    %400 = math.tanh %399 : vector<8x128xf32>
    %401 = vector.extract_strided_slice %400 {offsets = [0, 0], sizes = [8, 96], strides = [1, 1]} : vector<8x128xf32> to vector<8x96xf32>
    %cst_155 = arith.constant 5.000000e-01 : f32
    %402 = vector.broadcast %cst_155 : f32 to vector<8x96xf32>
    %403 = arith.mulf %402, %401 : vector<8x96xf32>
    %cst_156 = arith.constant 5.000000e-01 : f32
    %404 = vector.broadcast %cst_156 : f32 to vector<8x96xf32>
    %405 = arith.addf %403, %404 : vector<8x96xf32>
    %406 = vector.extract_strided_slice %400 {offsets = [0, 96], sizes = [8, 32], strides = [1, 1]} : vector<8x128xf32> to vector<8x32xf32>
    %407 = vector.extract_strided_slice %405 {offsets = [0, 32], sizes = [8, 32], strides = [1, 1]} : vector<8x96xf32> to vector<8x32xf32>
    %408 = arith.mulf %407, %392 : vector<8x32xf32>
    %409 = vector.extract_strided_slice %405 {offsets = [0, 0], sizes = [8, 32], strides = [1, 1]} : vector<8x96xf32> to vector<8x32xf32>
    %410 = arith.mulf %409, %406 : vector<8x32xf32>
    %411 = arith.addf %408, %410 : vector<8x32xf32>
    %412 = vector.extract_strided_slice %405 {offsets = [0, 64], sizes = [8, 32], strides = [1, 1]} : vector<8x96xf32> to vector<8x32xf32>
    %413 = math.tanh %411 : vector<8x32xf32>
    %414 = arith.mulf %412, %413 : vector<8x32xf32>
    %415 = arith.truncf %414 : vector<8x32xf32> to vector<8x32xbf16>
    %c0_157 = arith.constant 0 : index
    %c0_158 = arith.constant 0 : index
    %416 = vector.load %arg6[%c0_157, %c0_158] : memref<32x8xbf16, #tpu.memory_space<vmem>>, vector<32x8xbf16>
    %cst_159 = arith.constant dense<0.000000e+00> : vector<8x8xf32>
    %417 = tpu.matmul %415, %416, %cst_159 {dimension_numbers = #tpu.dot_dimension_numbers<[1], [0], [0], [1], [0, 0, 1, 1], [], []>} : vector<8x32xbf16>, vector<32x8xbf16>, vector<8x8xf32> -> vector<8x8xf32>
    %c0_160 = arith.constant 0 : index
    %c0_161 = arith.constant 0 : index
    %418 = vector.load %arg7[%c0_160, %c0_161] : memref<1x8xf32, #tpu.memory_space<vmem>>, vector<1x8xf32>
    %419 = vector.broadcast %418 : vector<1x8xf32> to vector<8x8xf32>
    %420 = arith.addf %417, %419 : vector<8x8xf32>
    %cst_162 = arith.constant 0.000000e+00 : f32
    %421 = vector.broadcast %cst_162 : f32 to vector<8x8xf32>
    %422 = arith.cmpf ogt, %420, %421 : vector<8x8xf32>
    %cst_163 = arith.constant 1.000000e-01 : f32
    %423 = vector.broadcast %cst_163 : f32 to vector<8x8xf32>
    %424 = arith.mulf %423, %420 : vector<8x8xf32>
    %425 = arith.select %422, %420, %424 : vector<8x8xi1>, vector<8x8xf32>
    %426 = arith.truncf %425 : vector<8x8xf32> to vector<8x8xbf16>
    %c0_164 = arith.constant 0 : index
    %c0_165 = arith.constant 0 : index
    %427 = vector.load %arg8[%c0_164, %c0_165] : memref<8x1xbf16, #tpu.memory_space<vmem>>, vector<8x1xbf16>
    %cst_166 = arith.constant dense<0.000000e+00> : vector<8x1xf32>
    %428 = tpu.matmul %426, %427, %cst_166 {dimension_numbers = #tpu.dot_dimension_numbers<[1], [0], [0], [1], [0, 0, 1, 1], [], []>} : vector<8x8xbf16>, vector<8x1xbf16>, vector<8x1xf32> -> vector<8x1xf32>
    %c0_167 = arith.constant 0 : index
    %c0_168 = arith.constant 0 : index
    %429 = vector.load %arg9[%c0_167, %c0_168] : memref<1x1xf32, #tpu.memory_space<vmem>>, vector<1x1xf32>
    %430 = vector.broadcast %429 : vector<1x1xf32> to vector<8x1xf32>
    %431 = arith.addf %428, %430 : vector<8x1xf32>
    %432 = arith.negf %431 : vector<8x1xf32>
    %433 = math.exp %432 : vector<8x1xf32>
    %cst_169 = arith.constant 1.000000e+00 : f32
    %434 = vector.broadcast %cst_169 : f32 to vector<8x1xf32>
    %435 = arith.addf %434, %433 : vector<8x1xf32>
    %436 = arith.divf %434, %435 : vector<8x1xf32>
    %c0_170 = arith.constant 0 : index
    %c0_171 = arith.constant 0 : index
    %437 = vector.load %arg10[%c0_170, %c0_171] : memref<8x1xf32, #tpu.memory_space<vmem>>, vector<8x1xf32>
    tpu.vector_store %arg10[%c0_170, %c0_171], %436 {strides = array<i32>} : memref<8x1xf32, #tpu.memory_space<vmem>>, vector<8x1xf32>,
    return
  }
  func.func @transform_0(%arg0: i32) -> (i32, i32, i32) {
    %c0_i32 = arith.constant 0 : i32
    %c0_i32_0 = arith.constant 0 : i32
    %c0_i32_1 = arith.constant 0 : i32
    return %c0_i32, %arg0, %c0_i32_0 : i32, i32, i32
  }
  func.func @transform_1(%arg0: i32) -> (i32, i32) {
    %c0_i32 = arith.constant 0 : i32
    %c0_i32_0 = arith.constant 0 : i32
    %c0_i32_1 = arith.constant 0 : i32
    return %c0_i32, %c0_i32_0 : i32, i32
  }
  func.func @transform_2(%arg0: i32) -> (i32, i32, i32) {
    %c0_i32 = arith.constant 0 : i32
    %c0_i32_0 = arith.constant 0 : i32
    %c0_i32_1 = arith.constant 0 : i32
    %c0_i32_2 = arith.constant 0 : i32
    return %c0_i32, %c0_i32_0, %c0_i32_1 : i32, i32, i32
  }
  func.func @transform_3(%arg0: i32) -> (i32, i32, i32) {
    %c0_i32 = arith.constant 0 : i32
    %c0_i32_0 = arith.constant 0 : i32
    %c0_i32_1 = arith.constant 0 : i32
    %c0_i32_2 = arith.constant 0 : i32
    return %c0_i32, %c0_i32_0, %c0_i32_1 : i32, i32, i32
  }
  func.func @transform_4(%arg0: i32) -> (i32, i32, i32) {
    %c0_i32 = arith.constant 0 : i32
    %c0_i32_0 = arith.constant 0 : i32
    %c0_i32_1 = arith.constant 0 : i32
    %c0_i32_2 = arith.constant 0 : i32
    return %c0_i32, %c0_i32_0, %c0_i32_1 : i32, i32, i32
  }
  func.func @transform_5(%arg0: i32) -> (i32, i32) {
    %c0_i32 = arith.constant 0 : i32
    %c0_i32_0 = arith.constant 0 : i32
    %c0_i32_1 = arith.constant 0 : i32
    return %c0_i32, %c0_i32_0 : i32, i32
  }
  func.func @transform_6(%arg0: i32) -> (i32, i32) {
    %c0_i32 = arith.constant 0 : i32
    %c0_i32_0 = arith.constant 0 : i32
    %c0_i32_1 = arith.constant 0 : i32
    return %c0_i32, %c0_i32_0 : i32, i32
  }
  func.func @transform_7(%arg0: i32) -> (i32, i32) {
    %c0_i32 = arith.constant 0 : i32
    %c0_i32_0 = arith.constant 0 : i32
    %c0_i32_1 = arith.constant 0 : i32
    return %c0_i32, %c0_i32_0 : i32, i32
  }
  func.func @transform_8(%arg0: i32) -> (i32, i32) {
    %c0_i32 = arith.constant 0 : i32
    %c0_i32_0 = arith.constant 0 : i32
    %c0_i32_1 = arith.constant 0 : i32
    return %c0_i32, %c0_i32_0 : i32, i32
  }
  func.func @transform_9(%arg0: i32) -> (i32, i32) {
    %c0_i32 = arith.constant 0 : i32
    %c0_i32_0 = arith.constant 0 : i32
    return %arg0, %c0_i32 : i32, i32
  }
}

</mosaic_0001>

<bundles_post_ra>
// kernel: shutel_forward.1
= control target key start
LH: loop header
LB: loop body
LE: loop exit
PB: predicated region body
PF: predicated region fallthrough
CT: control target
= control target key end

     0   :  { %vm49_vm0 = vcmask 1043456   ;;  %v2534_v0 = vmov 0.0   ;;  %vm2535_vm1 = vmmov 0   ;;  %vm45_vm2 = vcmask 64512   ;;  %s2537_s24 = smov 32   ;;  %s3021_s1 = inlined_call_operand.vmem [shape: bf16[8,128], index: 1, kind: input, shape index: {}]   ;;  %s3022_s0 = inlined_call_operand.vmem [shape: f32[8,8,8], index: 0, kind: input, shape index: {}]   ;;  %s3023_s3 = inlined_call_operand.vmem [shape: bf16[2,32,128], index: 3, kind: input, shape index: {}]   ;;  %s3024_s4 = inlined_call_operand.vmem [shape: f32[2,1,128], index: 4, kind: input, shape index: {}]   ;;  %s3025_s2 = inlined_call_operand.vmem [shape: bf16[1,32,128], index: 2, kind: input, shape index: {}]   ;;  %s3026_s5 = inlined_call_operand.vmem [shape: bf16[32,8], index: 5, kind: input, shape index: {}]   ;;  %s3027_s7 = inlined_call_operand.vmem [shape: bf16[8,1], index: 7, kind: input, shape index: {}]   ;;  %s3028_s8 = inlined_call_operand.<no memory space> [shape: f32[1,1], index: 8, kind: input, shape index: {}]   ;;  %s3029_s6 = inlined_call_operand.vmem [shape: f32[1,8], index: 6, kind: input, shape index: {}]   ;;  %s3030_s9 = inlined_call_operand.vmem [shape: f32[8,1], index: 9, kind: output, shape index: {}]  }
   0x1   :  { %2199 = vmatprep.subr.bf16.mxu0 %v2534_v0  ;;  %v35_v1 = vld [vmem:[%s3021_s1] sm:$0xf]  ;;  %2201 = vmatprep.mubr.msk.bf16.mxu0 %vm2535_vm1, %v2534_v0  ;;  %v2053_v5 = vld [vmem:[%s3022_s0 + $0x10] sm:$0xff]  ;;  %v2635_v11 = vld [vmem:[%s3023_s3 + $0x8] sm:$0xff]   ;;  %v2536_v13 = vmov 0   ;;  %vm446_vm3 = vcmask 261120  }
   0x2   :  { %v37_v2 = vld [vmem:[%s3022_s0] sm:$0xff]  ;;  %v2599_v3 = vsel %vm49_vm0, %v35_v1, 0  ;;  %2205 = vmatprep.subr.bf16.mxu1 %v2534_v0  ;;  %2207 = vmatprep.mubr.msk.bf16.mxu1 %vm2535_vm1, %v2534_v0  ;;  %v143_v6 = vpack.c.bf16 %v2053_v5, %v2053_v5  ;;  %v2061_v9 = vld [vmem:[%s3022_s0 + $0x30] sm:$0xff]  ;;  %v2051_v45 = vld [vmem:[%s3022_s0 + $0x8] sm:$0xff]  ;;  %vm2043_vm5 = vcmask 7168  }
   0x3   :  { %v38_v4 = vpack.c.bf16 %v37_v2, %v37_v2  ;;  %2200 = vmatpush3.bf16.msra.mxu0 %v2599_v3  ;;  %2206 = vmatpush3.bf16.msra.mxu1 %v2599_v3  ;;  %v2057_v7 = vld [vmem:[%s3022_s0 + $0x20] sm:$0xff]  ;;  %v331_v10 = vpack.c.bf16 %v2061_v9, %v2061_v9  ;;  %v96_v46 = vpack.c.bf16 %v2051_v45, %v2051_v45  ;;  %v2055_v47 = vld [vmem:[%s3022_s0 + $0x18] sm:$0xff]  ;;  %v2059_v50 = vld [vmem:[%s3022_s0 + $0x28] sm:$0xff] }
   0x4   :  { %2211 = vmatprep.subr.bf16.mxu0 %v2534_v0  ;;  %2217 = vmatprep.subr.bf16.mxu1 %v2534_v0  ;;  %v237_v8 = vpack.c.bf16 %v2057_v7, %v2057_v7  ;;  %v2642_v12 = vld [vmem:[%s3023_s3] sm:$0xff]   ;;  %v190_v48 = vpack.c.bf16 %v2055_v47, %v2055_v47  ;;  %v284_v51 = vpack.c.bf16 %v2059_v50, %v2059_v50  ;;  %v2063_v52 = vld [vmem:[%s3022_s0 + $0x38] sm:$0xff]  ;;  %v2704_v54 = vld [vmem:[%s3025_s2 + $0x8] sm:$0xff]   ;;  %s2538_s0 = smov 64  }
   0x5   :  { %v2665_v28 = vld [vmem:[%s3024_s4] ss:$0 sm:$0xff]  ;;  %v378_v53 = vpack.c.bf16 %v2063_v52, %v2063_v52 }
   0x6   :  { %2202 = vmatmul.mubr.msk.bf16.vlgmr.msra.gmra.mxu0 %vm45_vm2, %v38_v4  ;;  %2208 = vmatmul.mubr.msk.bf16.vlgmr.msra.gmra.mxu1 %vm45_vm2, %v96_v46  ;;  %v2711_v55 = vld [vmem:[%s3025_s2] sm:$0xff]  }
   0x7   :  { %2212 = vmatpush3.bf16.msra.mxu0 %v2599_v3  ;;  %2213 = vmatprep.mubr.msk.bf16.mxu0 %vm2535_vm1, %v2534_v0 }
   0x8   :  { %2223 = vmatprep.subr.bf16.mxu0 %v2534_v0  ;;  %2218 = vmatpush3.bf16.msra.mxu1 %v2599_v3 }
   0x9   :  { %2219 = vmatprep.mubr.msk.bf16.mxu1 %vm2535_vm1, %v2534_v0  ;;  %2229 = vmatprep.subr.bf16.mxu1 %v2534_v0 }
   0xe   :  { %2214 = vmatmul.mubr.msk.bf16.vlgmr.msra.gmra.mxu0 %vm45_vm2, %v143_v6  ;;  %2220 = vmatmul.mubr.msk.bf16.vlgmr.msra.gmra.mxu1 %vm45_vm2, %v190_v48 }
   0xf   :  { %2224 = vmatpush3.bf16.msra.mxu0 %v2599_v3  ;;  %2225 = vmatprep.mubr.msk.bf16.mxu0 %vm2535_vm1, %v2534_v0 }
  0x10   :  { %2235 = vmatprep.subr.bf16.mxu0 %v2534_v0  ;;  %2230 = vmatpush3.bf16.msra.mxu1 %v2599_v3 }
  0x11   :  { %2231 = vmatprep.mubr.msk.bf16.mxu1 %vm2535_vm1, %v2534_v0  ;;  %2241 = vmatprep.subr.bf16.mxu1 %v2534_v0 }
  0x16   :  { %2226 = vmatmul.mubr.msk.bf16.vlgmr.msra.gmra.mxu0 %vm45_vm2, %v237_v8  ;;  %2232 = vmatmul.mubr.msk.bf16.vlgmr.msra.gmra.mxu1 %vm45_vm2, %v284_v51 }
  0x17   :  { %2236 = vmatpush3.bf16.msra.mxu0 %v2599_v3  ;;  %2237 = vmatprep.mubr.msk.bf16.mxu0 %vm2535_vm1, %v2534_v0 }
  0x18   :  { %2247 = vmatprep.subr.bf16.mxu0 %v2534_v0  ;;  %2242 = vmatpush3.bf16.msra.mxu1 %v2599_v3 }
  0x19   :  { %2243 = vmatprep.mubr.msk.bf16.mxu1 %vm2535_vm1, %v2534_v0  ;;  %2255 = vmatprep.subr.bf16.mxu1 %v2534_v0 }
  0x1e   :  { %2238 = vmatmul.mubr.msk.bf16.vlgmr.msra.gmra.mxu0 %vm45_vm2, %v331_v10  ;;  %2244 = vmatmul.mubr.msk.bf16.vlgmr.msra.gmra.mxu1 %vm45_vm2, %v378_v53 }
  0x1f   :  { %2248 = vmatpush3.bf16.msra.mxu0 %v2635_v11  ;;  %2251 = vmatprep.mubr.msk.bf16.mxu0 %vm2535_vm1, %v2534_v0 }
  0x20   :  { %2249 = vmatprep.subr.bf16.mxu0 %v2534_v0  ;;  %2256 = vmatpush3.bf16.msra.mxu1 %v2704_v54 }
  0x21   :  { %2259 = vmatprep.mubr.msk.bf16.mxu1 %vm2535_vm1, %v2534_v0  ;;  %2257 = vmatprep.subr.bf16.mxu1 %v2534_v0 }
  0x23   :  { %2250 = vmatpush3.bf16.msra.mxu0 %v2642_v12 }
  0x24   :  { %2263 = vmatprep.subr.bf16.mxu0 %v2534_v0  ;;  %2258 = vmatpush3.bf16.msra.mxu1 %v2711_v55 }
  0x25   :  { %2271 = vmatprep.subr.bf16.mxu1 %v2534_v0 }
  0x26   :  { %2252 = vmatmul.mubr.bf16.vlgmr.msra.gmra.mxu0 %v2536_v13 }
  0x27   :  { %2264 = vmatpush3.bf16.msra.mxu0 %v2635_v11  ;;  %2267 = vmatprep.mubr.msk.bf16.mxu0 %vm2535_vm1, %v2534_v0 }
  0x28   :  { %2265 = vmatprep.subr.bf16.mxu0 %v2534_v0 }
  0x2b   :  { %2266 = vmatpush3.bf16.msra.mxu0 %v2642_v12 }
  0x2c   :  { %2279 = vmatprep.subr.bf16.mxu0 %v2534_v0 }
  0xc6   :  { %v87_v14 = vpop.f32.mrf.mxu0  ;;  %v134_v59 = vpop.f32.mrf.mxu1 }
  0xc7   :  { %v88_v31 = vadd.f32 %v2665_v28, %v87_v14 }
  0xc8   :  { %v2203_v15 = vpop.f32.mrf.mxu0  ;;  %v2209_v60 = vpop.f32.mrf.mxu1 }
  0xca   :  { %v90_v16 = vpop.f32.mrf.mxu0  ;;  %v137_v61 = vpop.f32.mrf.mxu1 }
  0xcb   :  { %v135_v16 = vadd.f32 %v2665_v28, %v134_v59 }
  0xcc   :  { %v2204_v17 = vpop.f32.mrf.mxu0  ;;  %v2210_v62 = vpop.f32.mrf.mxu1 }
  0xce   :  { %v2656_v18 = vpop.f32.mrf.mxu0  ;;  %v2719_v63 = vpop.f32.mrf.mxu1 }
  0xd0   :  { %v2215_v19 = vpop.f32.mrf.mxu0  ;;  %v2221_v1 = vpop.f32.mrf.mxu1 }
  0xd2   :  { %v184_v20 = vpop.f32.mrf.mxu0  ;;  %v231_v2 = vpop.f32.mrf.mxu1 }
  0xd4   :  { %v2216_v21 = vpop.f32.mrf.mxu0  ;;  %v2222_v3 = vpop.f32.mrf.mxu1 }
  0xd6   :  { %v2658_v22 = vpop.f32.mrf.mxu0  ;;  %v2721_v4 = vpop.f32.mrf.mxu1 }
  0xd8   :  { %v2227_v23 = vpop.f32.mrf.mxu0  ;;  %v2233_v5 = vpop.f32.mrf.mxu1 }
  0xda   :  { %v278_v24 = vpop.f32.mrf.mxu0  ;;  %v325_v6 = vpop.f32.mrf.mxu1 }
  0xdb   :  { %v229_v6 = vadd.f32 %v2665_v28, %v2719_v63 }
  0xdc   :  { %v2228_v25 = vpop.f32.mrf.mxu0  ;;  %v2234_v7 = vpop.f32.mrf.mxu1 }
  0xde   :  { %v2660_v26 = vpop.f32.mrf.mxu0  ;;  %v2723_v8 = vpop.f32.mrf.mxu1 }
  0xe0   :  { %v2239_v27 = vpop.f32.mrf.mxu0  ;;  %v2245_v9 = vpop.f32.mrf.mxu1 }
  0xe2   :  { %v372_v29 = vpop.f32.mrf.mxu0  ;;  %v419_v10 = vpop.f32.mrf.mxu1 }
  0xe4   :  { %v2240_v30 = vpop.f32.mrf.mxu0  ;;  %v2246_v14 = vpop.f32.mrf.mxu1 }
  0xe6   :  { %v484_v32 = vpop.f32.mrf.mxu0 }
  0xe7   :  { %v490_v33 = vadd.f32 %v484_v32, %v88_v31 }
  0xe8   :  { %v2253_v34 = vpop.f32.mrf.mxu0 }
  0xe9   :  { %2466 = vtanh.f32 %v490_v33 }
  0xea   :  { %v487_v35 = vpop.f32.mrf.mxu0 }
  0xec   :  { %v2254_v36 = vpop.f32.mrf.mxu0 }
  0xf6   :  { %v2467_v37 = vpop.eup %2466 }
  0xf7   :  { %496 = vrot.lane.b32.xlu0 %v2467_v37, %s2537_s24  ;;  %v492_v38 = vmul.f32 0.5, %v2467_v37 }
  0xf9   :  { %v493_v39 = vadd.f32 0.5, %v492_v38 }
  0xfb   :  { %v494_v42 = vmul.f32 0.0, %v493_v39 }
 0x169   :  { %v497_v40 = vpop.permute.xlu0 %496 }
 0x16a   :  { %v499_v41 = vmul.f32 %v497_v40, %v493_v39 }
 0x16c   :  { %501 = vrot.lane.b32.xlu0 %v499_v41, %s2537_s24 }
 0x1de   :  { %v502_v43 = vpop.permute.xlu0 %501 }
 0x1df   :  { %v2670_v44 = vadd.f32 %v502_v43, %v494_v42  ;;  %v182_v43 = vadd.f32 %v2665_v28, %v2656_v18 }
 0x1e1   :  { %2468 = vtanh.f32 %v2670_v44 }
 0x1ee   :  { %v2469_v49 = vpop.eup %2468 }
 0x1ef   :  { %507 = vrot.lane.b32.xlu1 %v2469_v49, %s2537_s24 }
 0x261   :  { %v508_v56 = vpop.permute.xlu1 %507 }
 0x262   :  { %v510_v57 = vmul.f32 %v508_v56, %v493_v39 }
 0x264   :  { %v511_v58 = vpack.c.bf16 %v510_v57, %v510_v57 }
 0x266   :  { %519 = vrot.lane.b32.xlu1 %v511_v58, %s2538_s0 }
 0x2d8   :  { %v520_v15 = vpop.permute.xlu1 %519 }
 0x2d9   :  { %2260 = vmatmul.mubr.msk.bf16.vlgmr.msra.gmra.mxu1 %vm446_vm3, %v520_v15  ;;  %2268 = vmatmul.mubr.msk.bf16.vlgmr.msra.gmra.mxu0 %vm446_vm3, %v520_v15 }
 0x2da   :  { %2272 = vmatpush3.bf16.msra.mxu1 %v2704_v54  ;;  %2280 = vmatpush3.bf16.msra.mxu0 %v2635_v11 }
 0x2db   :  { %2273 = vmatprep.subr.bf16.mxu1 %v2534_v0  ;;  %2281 = vmatprep.subr.bf16.mxu0 %v2534_v0 }
 0x2dc   :  { %2275 = vmatprep.mubr.msk.bf16.mxu1 %vm2535_vm1, %v2534_v0  ;;  %2283 = vmatprep.mubr.msk.bf16.mxu0 %vm2535_vm1, %v2534_v0 }
 0x2de   :  { %2274 = vmatpush3.bf16.msra.mxu1 %v2711_v55  ;;  %2282 = vmatpush3.bf16.msra.mxu0 %v2642_v12 }
 0x2df   :  { %2287 = vmatprep.subr.bf16.mxu1 %v2534_v0  ;;  %2295 = vmatprep.subr.bf16.mxu0 %v2534_v0 }
 0x399   :  { %v2740_v17 = vpop.f32.mrf.mxu1  ;;  %v612_v19 = vpop.f32.mrf.mxu0 }
 0x39a   :  { %v618_v20 = vadd.f32 %v612_v19, %v135_v16 }
 0x39b   :  { %v2261_v21 = vpop.f32.mrf.mxu1  ;;  %v2269_v23 = vpop.f32.mrf.mxu0 }
 0x39c   :  { %2470 = vtanh.f32 %v618_v20 }
 0x39d   :  { %v573_v24 = vpop.f32.mrf.mxu1  ;;  %v615_v25 = vpop.f32.mrf.mxu0 }
 0x39f   :  { %v2262_v27 = vpop.f32.mrf.mxu1  ;;  %v2270_v29 = vpop.f32.mrf.mxu0 }
 0x3a9   :  { %v2471_v30 = vpop.eup %2470 }
 0x3aa   :  { %624 = vrot.lane.b32.xlu0 %v2471_v30, %s2537_s24  ;;  %v620_v31 = vmul.f32 0.5, %v2471_v30 }
 0x3ac   :  { %v621_v32 = vadd.f32 0.5, %v620_v31 }
 0x3ae   :  { %v622_v35 = vmul.f32 %v621_v32, %v2670_v44 }
 0x41c   :  { %v625_v33 = vpop.permute.xlu0 %624 }
 0x41d   :  { %v627_v34 = vmul.f32 %v625_v33, %v621_v32 }
 0x41f   :  { %629 = vrot.lane.b32.xlu1 %v627_v34, %s2537_s24 }
 0x491   :  { %v630_v36 = vpop.permute.xlu1 %629 }
 0x492   :  { %v632_v37 = vadd.f32 %v630_v36, %v622_v35 }
 0x494   :  { %2472 = vtanh.f32 %v632_v37 }
 0x4a1   :  { %v2473_v38 = vpop.eup %2472 }
 0x4a2   :  { %635 = vrot.lane.b32.xlu0 %v2473_v38, %s2537_s24 }
 0x514   :  { %v636_v39 = vpop.permute.xlu0 %635 }
 0x515   :  { %v638_v40 = vmul.f32 %v636_v39, %v621_v32 }
 0x517   :  { %v639_v41 = vpack.c.bf16 %v638_v40, %v638_v40 }
 0x519   :  { %641 = vrot.lane.b32.xlu1 %v639_v41, %s2538_s0 }
 0x58b   :  { %v642_v42 = vpop.permute.xlu1 %641 }
 0x58c   :  { %2276 = vmatmul.mubr.msk.bf16.vlgmr.msra.gmra.mxu1 %vm446_vm3, %v642_v42  ;;  %2284 = vmatmul.mubr.msk.bf16.vlgmr.msra.gmra.mxu0 %vm446_vm3, %v642_v42 }
 0x58d   :  { %2288 = vmatpush3.bf16.msra.mxu1 %v2704_v54  ;;  %2296 = vmatpush3.bf16.msra.mxu0 %v2635_v11 }
 0x58e   :  { %2289 = vmatprep.subr.bf16.mxu1 %v2534_v0  ;;  %2297 = vmatprep.subr.bf16.mxu0 %v2534_v0 }
 0x58f   :  { %2291 = vmatprep.mubr.msk.bf16.mxu1 %vm2535_vm1, %v2534_v0  ;;  %2299 = vmatprep.mubr.msk.bf16.mxu0 %vm2535_vm1, %v2534_v0 }
 0x591   :  { %2290 = vmatpush3.bf16.msra.mxu1 %v2711_v55  ;;  %2298 = vmatpush3.bf16.msra.mxu0 %v2642_v12 }
 0x592   :  { %2303 = vmatprep.subr.bf16.mxu1 %v2534_v0  ;;  %2311 = vmatprep.subr.bf16.mxu0 %v2534_v0 }
 0x64c   :  { %v2763_v44 = vpop.f32.mrf.mxu1  ;;  %v722_v45 = vpop.f32.mrf.mxu0 }
 0x64d   :  { %v728_v46 = vadd.f32 %v722_v45, %v182_v43 }
 0x64e   :  { %v2277_v47 = vpop.f32.mrf.mxu1  ;;  %v2285_v48 = vpop.f32.mrf.mxu0 }
 0x64f   :  { %2474 = vtanh.f32 %v728_v46 }
 0x650   :  { %v683_v49 = vpop.f32.mrf.mxu1  ;;  %v725_v50 = vpop.f32.mrf.mxu0 }
 0x652   :  { %v2278_v51 = vpop.f32.mrf.mxu1  ;;  %v2286_v52 = vpop.f32.mrf.mxu0 }
 0x65c   :  { %v2475_v53 = vpop.eup %2474 }
 0x65d   :  { %734 = vrot.lane.b32.xlu0 %v2475_v53, %s2537_s24  ;;  %v730_v56 = vmul.f32 0.5, %v2475_v53 }
 0x65f   :  { %v731_v57 = vadd.f32 0.5, %v730_v56 }
 0x661   :  { %v732_v18 = vmul.f32 %v731_v57, %v632_v37  ;;  %v276_v37 = vadd.f32 %v2665_v28, %v2658_v22 }
 0x6cf   :  { %v735_v58 = vpop.permute.xlu0 %734 }
 0x6d0   :  { %v737_v59 = vmul.f32 %v735_v58, %v731_v57 }
 0x6d2   :  { %739 = vrot.lane.b32.xlu1 %v737_v59, %s2537_s24 }
 0x744   :  { %v740_v60 = vpop.permute.xlu1 %739 }
 0x745   :  { %v742_v61 = vadd.f32 %v740_v60, %v732_v18 }
 0x747   :  { %2476 = vtanh.f32 %v742_v61 }
 0x754   :  { %v2477_v62 = vpop.eup %2476 }
 0x755   :  { %745 = vrot.lane.b32.xlu0 %v2477_v62, %s2537_s24 }
 0x7c7   :  { %v746_v1 = vpop.permute.xlu0 %745 }
 0x7c8   :  { %v748_v2 = vmul.f32 %v746_v1, %v731_v57 }
 0x7ca   :  { %v749_v3 = vpack.c.bf16 %v748_v2, %v748_v2 }
 0x7cc   :  { %751 = vrot.lane.b32.xlu1 %v749_v3, %s2538_s0 }
 0x83e   :  { %v752_v5 = vpop.permute.xlu1 %751 }
 0x83f   :  { %2292 = vmatmul.mubr.msk.bf16.vlgmr.msra.gmra.mxu1 %vm446_vm3, %v752_v5  ;;  %2300 = vmatmul.mubr.msk.bf16.vlgmr.msra.gmra.mxu0 %vm446_vm3, %v752_v5 }
 0x840   :  { %2304 = vmatpush3.bf16.msra.mxu1 %v2704_v54  ;;  %2312 = vmatpush3.bf16.msra.mxu0 %v2635_v11 }
 0x841   :  { %2305 = vmatprep.subr.bf16.mxu1 %v2534_v0  ;;  %2313 = vmatprep.subr.bf16.mxu0 %v2534_v0 }
 0x842   :  { %2307 = vmatprep.mubr.msk.bf16.mxu1 %vm2535_vm1, %v2534_v0  ;;  %2315 = vmatprep.mubr.msk.bf16.mxu0 %vm2535_vm1, %v2534_v0 }
 0x844   :  { %2306 = vmatpush3.bf16.msra.mxu1 %v2711_v55  ;;  %2314 = vmatpush3.bf16.msra.mxu0 %v2642_v12 }
 0x845   :  { %2319 = vmatprep.subr.bf16.mxu1 %v2534_v0  ;;  %2327 = vmatprep.subr.bf16.mxu0 %v2534_v0 }
 0x8ff   :  { %v2785_v7 = vpop.f32.mrf.mxu1  ;;  %v832_v9 = vpop.f32.mrf.mxu0 }
 0x900   :  { %v838_v10 = vadd.f32 %v832_v9, %v229_v6 }
 0x901   :  { %v2293_v14 = vpop.f32.mrf.mxu1  ;;  %v2301_v15 = vpop.f32.mrf.mxu0 }
 0x902   :  { %2478 = vtanh.f32 %v838_v10 }
 0x903   :  { %v793_v16 = vpop.f32.mrf.mxu1  ;;  %v835_v19 = vpop.f32.mrf.mxu0 }
 0x905   :  { %v2294_v20 = vpop.f32.mrf.mxu1  ;;  %v2302_v21 = vpop.f32.mrf.mxu0 }
 0x90f   :  { %v2479_v23 = vpop.eup %2478 }
 0x910   :  { %844 = vrot.lane.b32.xlu0 %v2479_v23, %s2537_s24  ;;  %v840_v24 = vmul.f32 0.5, %v2479_v23 }
 0x912   :  { %v841_v25 = vadd.f32 0.5, %v840_v24 }
 0x914   :  { %v842_v63 = vmul.f32 %v841_v25, %v742_v61  ;;  %v323_v61 = vadd.f32 %v2665_v28, %v2721_v4 }
 0x982   :  { %v845_v27 = vpop.permute.xlu0 %844 }
 0x983   :  { %v847_v29 = vmul.f32 %v845_v27, %v841_v25 }
 0x985   :  { %849 = vrot.lane.b32.xlu1 %v847_v29, %s2537_s24 }
 0x9f7   :  { %v850_v30 = vpop.permute.xlu1 %849 }
 0x9f8   :  { %v852_v31 = vadd.f32 %v850_v30, %v842_v63 }
 0x9fa   :  { %2480 = vtanh.f32 %v852_v31 }
 0xa07   :  { %v2481_v32 = vpop.eup %2480 }
 0xa08   :  { %855 = vrot.lane.b32.xlu0 %v2481_v32, %s2537_s24 }
 0xa7a   :  { %v856_v33 = vpop.permute.xlu0 %855 }
 0xa7b   :  { %v858_v34 = vmul.f32 %v856_v33, %v841_v25 }
 0xa7d   :  { %v859_v35 = vpack.c.bf16 %v858_v34, %v858_v34 }
 0xa7f   :  { %861 = vrot.lane.b32.xlu1 %v859_v35, %s2538_s0 }
 0xaf1   :  { %v862_v36 = vpop.permute.xlu1 %861 }
 0xaf2   :  { %2308 = vmatmul.mubr.msk.bf16.vlgmr.msra.gmra.mxu1 %vm446_vm3, %v862_v36  ;;  %2316 = vmatmul.mubr.msk.bf16.vlgmr.msra.gmra.mxu0 %vm446_vm3, %v862_v36 }
 0xaf3   :  { %2320 = vmatpush3.bf16.msra.mxu1 %v2704_v54  ;;  %2328 = vmatpush3.bf16.msra.mxu0 %v2635_v11 }
 0xaf4   :  { %2321 = vmatprep.subr.bf16.mxu1 %v2534_v0  ;;  %2329 = vmatprep.subr.bf16.mxu0 %v2534_v0 }
 0xaf5   :  { %2323 = vmatprep.mubr.msk.bf16.mxu1 %vm2535_vm1, %v2534_v0  ;;  %2331 = vmatprep.mubr.msk.bf16.mxu0 %vm2535_vm1, %v2534_v0 }
 0xaf7   :  { %2322 = vmatpush3.bf16.msra.mxu1 %v2711_v55  ;;  %2330 = vmatpush3.bf16.msra.mxu0 %v2642_v12 }
 0xaf8   :  { %2335 = vmatprep.subr.bf16.mxu1 %v2534_v0  ;;  %2343 = vmatprep.subr.bf16.mxu0 %v2534_v0 }
 0xbb2   :  { %v2807_v38 = vpop.f32.mrf.mxu1  ;;  %v942_v39 = vpop.f32.mrf.mxu0 }
 0xbb3   :  { %v948_v40 = vadd.f32 %v942_v39, %v276_v37 }
 0xbb4   :  { %v2309_v41 = vpop.f32.mrf.mxu1  ;;  %v2317_v42 = vpop.f32.mrf.mxu0 }
 0xbb5   :  { %2482 = vtanh.f32 %v948_v40 }
 0xbb6   :  { %v903_v43 = vpop.f32.mrf.mxu1  ;;  %v945_v45 = vpop.f32.mrf.mxu0 }
 0xbb8   :  { %v2310_v46 = vpop.f32.mrf.mxu1  ;;  %v2318_v47 = vpop.f32.mrf.mxu0 }
 0xbc2   :  { %v2483_v48 = vpop.eup %2482 }
 0xbc3   :  { %954 = vrot.lane.b32.xlu0 %v2483_v48, %s2537_s24  ;;  %v950_v49 = vmul.f32 0.5, %v2483_v48 }
 0xbc5   :  { %v951_v50 = vadd.f32 0.5, %v950_v49 }
 0xbc7   :  { %v952_v22 = vmul.f32 %v951_v50, %v852_v31 }
 0xc35   :  { %v955_v51 = vpop.permute.xlu0 %954 }
 0xc36   :  { %v957_v52 = vmul.f32 %v955_v51, %v951_v50 }
 0xc38   :  { %959 = vrot.lane.b32.xlu1 %v957_v52, %s2537_s24  ;;  %v2860_v52 = vld [vmem:[%s3023_s3 + $0x18] sm:$0xff]  }
 0xcaa   :  { %v960_v53 = vpop.permute.xlu1 %959 }
 0xcab   :  { %v962_v56 = vadd.f32 %v960_v53, %v952_v22  ;;  %v2868_v53 = vld [vmem:[%s3023_s3 + $0x10] sm:$0xff]  }
 0xcad   :  { %2484 = vtanh.f32 %v962_v56 }
 0xcba   :  { %v2485_v57 = vpop.eup %2484 }
 0xcbb   :  { %965 = vrot.lane.b32.xlu0 %v2485_v57, %s2537_s24 }
 0xd2d   :  { %v966_v58 = vpop.permute.xlu0 %965 }
 0xd2e   :  { %v968_v59 = vmul.f32 %v966_v58, %v951_v50 }
 0xd30   :  { %v969_v18 = vpack.c.bf16 %v968_v59, %v968_v59  ;;  %v2895_v59 = vld [vmem:[%s3024_s4 + $0x1] ss:$0 sm:$0xff] }
 0xd32   :  { %971 = vrot.lane.b32.xlu1 %v969_v18, %s2538_s0 }
 0xda4   :  { %v972_v60 = vpop.permute.xlu1 %971 }
 0xda5   :  { %2324 = vmatmul.mubr.msk.bf16.vlgmr.msra.gmra.mxu1 %vm446_vm3, %v972_v60  ;;  %2332 = vmatmul.mubr.msk.bf16.vlgmr.msra.gmra.mxu0 %vm446_vm3, %v972_v60 }
 0xda6   :  { %2336 = vmatpush3.bf16.msra.mxu1 %v2704_v54  ;;  %2344 = vmatpush3.bf16.msra.mxu0 %v2635_v11 }
 0xda7   :  { %2337 = vmatprep.subr.bf16.mxu1 %v2534_v0  ;;  %2345 = vmatprep.subr.bf16.mxu0 %v2534_v0 }
 0xda8   :  { %2339 = vmatprep.mubr.msk.bf16.mxu1 %vm2535_vm1, %v2534_v0  ;;  %2347 = vmatprep.mubr.msk.bf16.mxu0 %vm2535_vm1, %v2534_v0 }
 0xdaa   :  { %2338 = vmatpush3.bf16.msra.mxu1 %v2711_v55  ;;  %2346 = vmatpush3.bf16.msra.mxu0 %v2642_v12 }
 0xdab   :  { %2351 = vmatprep.subr.bf16.mxu1 %v2534_v0  ;;  %2359 = vmatprep.subr.bf16.mxu0 %v2534_v0 }
 0xe65   :  { %v2829_v62 = vpop.f32.mrf.mxu1  ;;  %v1052_v1 = vpop.f32.mrf.mxu0 }
 0xe66   :  { %v1058_v2 = vadd.f32 %v1052_v1, %v323_v61 }
 0xe67   :  { %v2325_v3 = vpop.f32.mrf.mxu1  ;;  %v2333_v5 = vpop.f32.mrf.mxu0 }
 0xe68   :  { %2486 = vtanh.f32 %v1058_v2  ;;  %v571_v2 = vadd.f32 %v2895_v59, %v2740_v17 }
 0xe69   :  { %v1013_v6 = vpop.f32.mrf.mxu1  ;;  %v1055_v9 = vpop.f32.mrf.mxu0 }
 0xe6b   :  { %v2326_v10 = vpop.f32.mrf.mxu1  ;;  %v2334_v14 = vpop.f32.mrf.mxu0 }
 0xe75   :  { %v2487_v15 = vpop.eup %2486 }
 0xe76   :  { %1064 = vrot.lane.b32.xlu0 %v2487_v15, %s2537_s24  ;;  %v1060_v16 = vmul.f32 0.5, %v2487_v15 }
 0xe78   :  { %v1061_v19 = vadd.f32 0.5, %v1060_v16 }
 0xe7a   :  { %v1062_v4 = vmul.f32 %v1061_v19, %v962_v56 }
 0xee8   :  { %v1065_v20 = vpop.permute.xlu0 %1064 }
 0xee9   :  { %v1067_v21 = vmul.f32 %v1065_v20, %v1061_v19 }
 0xeeb   :  { %1069 = vrot.lane.b32.xlu1 %v1067_v21, %s2537_s24 }
 0xf5d   :  { %v1070_v23 = vpop.permute.xlu1 %1069 }
 0xf5e   :  { %v1072_v24 = vadd.f32 %v1070_v23, %v1062_v4 }
 0xf60   :  { %2488 = vtanh.f32 %v1072_v24 }
 0xf6d   :  { %v2489_v25 = vpop.eup %2488 }
 0xf6e   :  { %1075 = vrot.lane.b32.xlu0 %v2489_v25, %s2537_s24 }
 0xfe0   :  { %v1076_v27 = vpop.permute.xlu0 %1075 }
 0xfe1   :  { %v1078_v29 = vmul.f32 %v1076_v27, %v1061_v19 }
 0xfe3   :  { %v1079_v63 = vpack.c.bf16 %v1078_v29, %v1078_v29 }
 0xfe5   :  { %1081 = vrot.lane.b32.xlu1 %v1079_v63, %s2538_s0 }
0x1057   :  { %v1082_v30 = vpop.permute.xlu1 %1081 }
0x1058   :  { %2340 = vmatmul.mubr.msk.bf16.vlgmr.msra.gmra.mxu1 %vm446_vm3, %v1082_v30  ;;  %2348 = vmatmul.mubr.msk.bf16.vlgmr.msra.gmra.mxu0 %vm446_vm3, %v1082_v30 }
0x1059   :  { %2352 = vmatpush3.bf16.msra.mxu1 %v2704_v54  ;;  %2360 = vmatpush3.bf16.msra.mxu0 %v2635_v11  ;;  %v370_v11 = vadd.f32 %v2665_v28, %v2660_v26 }
0x105a   :  { %2353 = vmatprep.subr.bf16.mxu1 %v2534_v0  ;;  %2361 = vmatprep.subr.bf16.mxu0 %v2534_v0 }
0x105b   :  { %2355 = vmatprep.mubr.msk.bf16.mxu1 %vm2535_vm1, %v2534_v0  ;;  %2363 = vmatprep.mubr.msk.bf16.mxu0 %vm2535_vm1, %v2534_v0 }
0x105d   :  { %2354 = vmatpush3.bf16.msra.mxu1 %v2711_v55  ;;  %2362 = vmatpush3.bf16.msra.mxu0 %v2642_v12 }
0x105e   :  { %2375 = vmatprep.subr.bf16.mxu0 %v2534_v0  ;;  %2367 = vmatprep.subr.bf16.mxu1 %v2534_v0 }
0x1118   :  { %v2851_v31 = vpop.f32.mrf.mxu1  ;;  %v1162_v32 = vpop.f32.mrf.mxu0 }
0x1119   :  { %v1168_v33 = vadd.f32 %v1162_v32, %v370_v11 }
0x111a   :  { %v2341_v34 = vpop.f32.mrf.mxu1  ;;  %v2349_v35 = vpop.f32.mrf.mxu0 }
0x111b   :  { %2490 = vtanh.f32 %v1168_v33 }
0x111c   :  { %v1123_v36 = vpop.f32.mrf.mxu1  ;;  %v1165_v37 = vpop.f32.mrf.mxu0 }
0x111e   :  { %v2342_v39 = vpop.f32.mrf.mxu1  ;;  %v2350_v40 = vpop.f32.mrf.mxu0 }
0x1128   :  { %v2491_v41 = vpop.eup %2490 }
0x1129   :  { %1174 = vrot.lane.b32.xlu0 %v2491_v41, %s2537_s24  ;;  %v1170_v12 = vmul.f32 0.5, %v2491_v41 }
0x112b   :  { %v1171_v42 = vadd.f32 0.5, %v1170_v12 }
0x112d   :  { %v1172_v26 = vmul.f32 %v1171_v42, %v1072_v24 }
0x119b   :  { %v1175_v43 = vpop.permute.xlu0 %1174 }
0x119c   :  { %v1177_v45 = vmul.f32 %v1175_v43, %v1171_v42 }
0x119e   :  { %1179 = vrot.lane.b32.xlu1 %v1177_v45, %s2537_s24  ;;  %v681_v45 = vadd.f32 %v2895_v59, %v2763_v44 }
0x1210   :  { %v1180_v46 = vpop.permute.xlu1 %1179 }
0x1211   :  { %v1182_v47 = vadd.f32 %v1180_v46, %v1172_v26 }
0x1213   :  { %2492 = vtanh.f32 %v1182_v47 }
0x1220   :  { %v2493_v48 = vpop.eup %2492 }
0x1221   :  { %1185 = vrot.lane.b32.xlu0 %v2493_v48, %s2537_s24 }
0x1293   :  { %v1186_v49 = vpop.permute.xlu0 %1185 }
0x1294   :  { %v1188_v50 = vmul.f32 %v1186_v49, %v1171_v42 }
0x1296   :  { %v1189_v51 = vpack.c.bf16 %v1188_v50, %v1188_v50 }
0x1298   :  { %1191 = vrot.lane.b32.xlu1 %v1189_v51, %s2538_s0 }
0x130a   :  { %v1192_v22 = vpop.permute.xlu1 %1191 }
0x130b   :  { %2356 = vmatmul.mubr.msk.bf16.vlgmr.msra.gmra.mxu1 %vm446_vm3, %v1192_v22  ;;  %2364 = vmatmul.mubr.msk.bf16.vlgmr.msra.gmra.mxu0 %vm446_vm3, %v1192_v22 }
0x130c   :  { %2376 = vmatpush3.bf16.msra.mxu0 %v2860_v52  ;;  %2379 = vmatprep.mubr.msk.bf16.mxu0 %vm2535_vm1, %v2534_v0 }
0x130d   :  { %2377 = vmatprep.subr.bf16.mxu0 %v2534_v0  ;;  %2368 = vmatpush3.bf16.msra.mxu1 %v2704_v54  ;;  %v417_v54 = vadd.f32 %v2665_v28, %v2723_v8 }
0x130e   :  { %2369 = vmatprep.subr.bf16.mxu1 %v2534_v0  ;;  %2371 = vmatprep.mubr.msk.bf16.mxu1 %vm2535_vm1, %v2534_v0 }
0x1310   :  { %2378 = vmatpush3.bf16.msra.mxu0 %v2868_v53 }
0x1311   :  { %2370 = vmatpush3.bf16.msra.mxu1 %v2711_v55  ;;  %2391 = vmatprep.subr.bf16.mxu0 %v2534_v0 }
0x1312   :  { %2383 = vmatprep.subr.bf16.mxu1 %v2534_v0 }
0x1313   :  { %2380 = vmatmul.mubr.bf16.vlgmr.msra.gmra.mxu0 %v2536_v13 }
0x1314   :  { %2392 = vmatpush3.bf16.msra.mxu0 %v2860_v52  ;;  %2395 = vmatprep.mubr.msk.bf16.mxu0 %vm2535_vm1, %v2534_v0 }
0x1315   :  { %2393 = vmatprep.subr.bf16.mxu0 %v2534_v0 }
0x1318   :  { %2394 = vmatpush3.bf16.msra.mxu0 %v2868_v53 }
0x1319   :  { %2407 = vmatprep.subr.bf16.mxu0 %v2534_v0 }
0x13cb   :  { %v2890_v55 = vpop.f32.mrf.mxu1  ;;  %v1272_v56 = vpop.f32.mrf.mxu0 }
0x13cc   :  { %v1278_v57 = vadd.f32 %v1272_v56, %v417_v54 }
0x13cd   :  { %v2357_v58 = vpop.f32.mrf.mxu1  ;;  %v2365_v13 = vpop.f32.mrf.mxu0 }
0x13ce   :  { %2494 = vtanh.f32 %v1278_v57 }
0x13cf   :  { %v1233_v18 = vpop.f32.mrf.mxu1  ;;  %v1275_v60 = vpop.f32.mrf.mxu0 }
0x13d1   :  { %v2358_v61 = vpop.f32.mrf.mxu1  ;;  %v2366_v1 = vpop.f32.mrf.mxu0 }
0x13d3   :  { %v1399_v28 = vpop.f32.mrf.mxu0 }
0x13d4   :  { %v1405_v8 = vadd.f32 %v1399_v28, %v571_v2  ;;  %v791_v2 = vadd.f32 %v2895_v59, %v2785_v7 }
0x13d5   :  { %v2381_v3 = vpop.f32.mrf.mxu0 }
0x13d6   :  { %2496 = vtanh.f32 %v1405_v8 }
0x13d7   :  { %v1402_v5 = vpop.f32.mrf.mxu0 }
0x13d9   :  { %v2382_v6 = vpop.f32.mrf.mxu0 }
0x13db   :  { %v2495_v9 = vpop.eup %2494 }
0x13dc   :  { %1284 = vrot.lane.b32.xlu0 %v2495_v9, %s2537_s24  ;;  %v1280_v14 = vmul.f32 0.5, %v2495_v9 }
0x13de   :  { %v1281_v15 = vadd.f32 0.5, %v1280_v14 }
0x13e0   :  { %v1282_v23 = vmul.f32 %v1281_v15, %v1182_v47 }
0x13e3   :  { %v2497_v10 = vpop.eup %2496 }
0x13e4   :  { %1411 = vrot.lane.b32.xlu1 %v2497_v10, %s2537_s24  ;;  %v1407_v20 = vmul.f32 0.5, %v2497_v10 }
0x13e6   :  { %v1408_v17 = vadd.f32 0.5, %v1407_v20 }
0x13e8   :  { %v1409_v27 = vmul.f32 0.0, %v1408_v17 }
0x144e   :  { %v1285_v16 = vpop.permute.xlu0 %1284 }
0x144f   :  { %v1287_v19 = vmul.f32 %v1285_v16, %v1281_v15 }
0x1451   :  { %1289 = vrot.lane.b32.xlu0 %v1287_v19, %s2537_s24 }
0x1456   :  { %v1412_v21 = vpop.permute.xlu1 %1411 }
0x1457   :  { %v1414_v4 = vmul.f32 %v1412_v21, %v1408_v17 }
0x1459   :  { %1416 = vrot.lane.b32.xlu1 %v1414_v4, %s2537_s24 }
0x14c3   :  { %v1290_v24 = vpop.permute.xlu0 %1289 }
0x14c4   :  { %v1292_v25 = vadd.f32 %v1290_v24, %v1282_v23 }
0x14c6   :  { %2498 = vtanh.f32 %v1292_v25  ;;  %v901_v25 = vadd.f32 %v2895_v59, %v2807_v38 }
0x14cb   :  { %v1417_v29 = vpop.permute.xlu1 %1416 }
0x14cc   :  { %v1419_v63 = vadd.f32 %v1417_v29, %v1409_v27 }
0x14ce   :  { %2500 = vtanh.f32 %v1419_v63 }
0x14d3   :  { %v2499_v30 = vpop.eup %2498 }
0x14d4   :  { %1295 = vrot.lane.b32.xlu0 %v2499_v30, %s2537_s24 }
0x14db   :  { %v2501_v11 = vpop.eup %2500 }
0x14dc   :  { %1422 = vrot.lane.b32.xlu1 %v2501_v11, %s2537_s24 }
0x1546   :  { %v1296_v32 = vpop.permute.xlu0 %1295 }
0x1547   :  { %v1298_v33 = vmul.f32 %v1296_v32, %v1281_v15 }
0x1549   :  { %v1299_v34 = vpack.c.bf16 %v1298_v33, %v1298_v33 }
0x154b   :  { %1301 = vrot.lane.b32.xlu0 %v1299_v34, %s2538_s0 }
0x154e   :  { %v1423_v35 = vpop.permute.xlu1 %1422 }
0x154f   :  { %v1425_v36 = vmul.f32 %v1423_v35, %v1408_v17 }
0x1551   :  { %v1427_v37 = vpack.c.bf16 %v1425_v36, %v1425_v36 }
0x1553   :  { %1429 = vrot.lane.b32.xlu1 %v1427_v37, %s2538_s0 }
0x15bd   :  { %v1302_v39 = vpop.permute.xlu0 %1301 }
0x15be   :  { %2372 = vmatmul.mubr.msk.bf16.vlgmr.msra.gmra.mxu1 %vm446_vm3, %v1302_v39 }
0x15bf   :  { %2384 = vmatpush3.bf16.msra.mxu1 %v2860_v52  ;;  %2387 = vmatprep.mubr.msk.bf16.mxu1 %vm2535_vm1, %v2534_v0 }
0x15c0   :  { %2385 = vmatprep.subr.bf16.mxu1 %v2534_v0 }
0x15c3   :  { %2386 = vmatpush3.bf16.msra.mxu1 %v2868_v53 }
0x15c4   :  { %2399 = vmatprep.subr.bf16.mxu1 %v2534_v0 }
0x15c5   :  { %v1430_v40 = vpop.permute.xlu1 %1429 }
0x15c6   :  { %2388 = vmatmul.mubr.msk.bf16.vlgmr.msra.gmra.mxu1 %vm446_vm3, %v1430_v40 }
0x15c7   :  { %2400 = vmatpush3.bf16.msra.mxu1 %v2860_v52  ;;  %2403 = vmatprep.mubr.msk.bf16.mxu1 %vm2535_vm1, %v2534_v0 }
0x15c8   :  { %2401 = vmatprep.subr.bf16.mxu1 %v2534_v0 }
0x15cb   :  { %2402 = vmatpush3.bf16.msra.mxu1 %v2868_v53 }
0x15cc   :  { %2415 = vmatprep.subr.bf16.mxu1 %v2534_v0 }
0x167e   :  { %v2921_v41 = vpop.f32.mrf.mxu1 }
0x1680   :  { %v2373_v12 = vpop.f32.mrf.mxu1 }
0x1682   :  { %v1343_v42 = vpop.f32.mrf.mxu1 }
0x1684   :  { %v2374_v43 = vpop.f32.mrf.mxu1 }
0x1686   :  { %v1468_v26 = vpop.f32.mrf.mxu1 }
0x1687   :  { %v1474_v46 = vadd.f32 %v1468_v26, %v681_v45  ;;  %v1011_v26 = vadd.f32 %v2895_v59, %v2829_v62 }
0x1688   :  { %v2389_v47 = vpop.f32.mrf.mxu1 }
0x1689   :  { %2502 = vtanh.f32 %v1474_v46 }
0x168a   :  { %v1471_v48 = vpop.f32.mrf.mxu1 }
0x168c   :  { %v2390_v49 = vpop.f32.mrf.mxu1 }
0x1696   :  { %v2503_v50 = vpop.eup %2502 }
0x1697   :  { %1480 = vrot.lane.b32.xlu0 %v2503_v50, %s2537_s24  ;;  %v1476_v51 = vmul.f32 0.5, %v2503_v50 }
0x1699   :  { %v1477_v22 = vadd.f32 0.5, %v1476_v51 }
0x169b   :  { %v1478_v57 = vmul.f32 %v1477_v22, %v1419_v63 }
0x1709   :  { %v1481_v54 = vpop.permute.xlu0 %1480 }
0x170a   :  { %v1483_v56 = vmul.f32 %v1481_v54, %v1477_v22 }
0x170c   :  { %1485 = vrot.lane.b32.xlu1 %v1483_v56, %s2537_s24 }
0x177e   :  { %v1486_v58 = vpop.permute.xlu1 %1485 }
0x177f   :  { %v1488_v13 = vadd.f32 %v1486_v58, %v1478_v57 }
0x1781   :  { %2504 = vtanh.f32 %v1488_v13 }
0x178e   :  { %v2505_v44 = vpop.eup %2504 }
0x178f   :  { %1491 = vrot.lane.b32.xlu0 %v2505_v44, %s2537_s24 }
0x1801   :  { %v1492_v18 = vpop.permute.xlu0 %1491 }
0x1802   :  { %v1494_v60 = vmul.f32 %v1492_v18, %v1477_v22 }
0x1804   :  { %v1496_v61 = vpack.c.bf16 %v1494_v60, %v1494_v60 }
0x1806   :  { %1498 = vrot.lane.b32.xlu1 %v1496_v61, %s2538_s0 }
0x1878   :  { %v1499_v1 = vpop.permute.xlu1 %1498 }
0x1879   :  { %2396 = vmatmul.mubr.msk.bf16.vlgmr.msra.gmra.mxu0 %vm446_vm3, %v1499_v1 }
0x187a   :  { %2408 = vmatpush3.bf16.msra.mxu0 %v2860_v52  ;;  %2411 = vmatprep.mubr.msk.bf16.mxu0 %vm2535_vm1, %v2534_v0 }
0x187b   :  { %2409 = vmatprep.subr.bf16.mxu0 %v2534_v0 }
0x187e   :  { %2410 = vmatpush3.bf16.msra.mxu0 %v2868_v53 }
0x187f   :  { %2423 = vmatprep.subr.bf16.mxu0 %v2534_v0 }
0x1939   :  { %v1537_v28 = vpop.f32.mrf.mxu0 }
0x193a   :  { %v1543_v8 = vadd.f32 %v1537_v28, %v791_v2  ;;  %v1121_v2 = vadd.f32 %v2895_v59, %v2851_v31 }
0x193b   :  { %v2397_v3 = vpop.f32.mrf.mxu0 }
0x193c   :  { %2506 = vtanh.f32 %v1543_v8 }
0x193d   :  { %v1540_v5 = vpop.f32.mrf.mxu0 }
0x193f   :  { %v2398_v6 = vpop.f32.mrf.mxu0 }
0x1949   :  { %v2507_v9 = vpop.eup %2506 }
0x194a   :  { %1549 = vrot.lane.b32.xlu0 %v2507_v9, %s2537_s24  ;;  %v1545_v10 = vmul.f32 0.5, %v2507_v9 }
0x194c   :  { %v1546_v14 = vadd.f32 0.5, %v1545_v10 }
0x194e   :  { %v1547_v19 = vmul.f32 %v1546_v14, %v1488_v13 }
0x19bc   :  { %v1550_v15 = vpop.permute.xlu0 %1549 }
0x19bd   :  { %v1552_v16 = vmul.f32 %v1550_v15, %v1546_v14 }
0x19bf   :  { %1554 = vrot.lane.b32.xlu1 %v1552_v16, %s2537_s24 }
0x1a31   :  { %v1555_v20 = vpop.permute.xlu1 %1554 }
0x1a32   :  { %v1557_v17 = vadd.f32 %v1555_v20, %v1547_v19 }
0x1a34   :  { %2508 = vtanh.f32 %v1557_v17 }
0x1a41   :  { %v2509_v7 = vpop.eup %2508 }
0x1a42   :  { %1560 = vrot.lane.b32.xlu0 %v2509_v7, %s2537_s24 }
0x1ab4   :  { %v1561_v21 = vpop.permute.xlu0 %1560 }
0x1ab5   :  { %v1563_v4 = vmul.f32 %v1561_v21, %v1546_v14 }
0x1ab7   :  { %v1565_v23 = vpack.c.bf16 %v1563_v4, %v1563_v4  ;;  %v1231_v4 = vadd.f32 %v2895_v59, %v2890_v55 }
0x1ab9   :  { %1567 = vrot.lane.b32.xlu1 %v1565_v23, %s2538_s0 }
0x1b2b   :  { %v1568_v24 = vpop.permute.xlu1 %1567 }
0x1b2c   :  { %2404 = vmatmul.mubr.msk.bf16.vlgmr.msra.gmra.mxu1 %vm446_vm3, %v1568_v24 }
0x1b2d   :  { %2416 = vmatpush3.bf16.msra.mxu1 %v2860_v52  ;;  %2419 = vmatprep.mubr.msk.bf16.mxu1 %vm2535_vm1, %v2534_v0 }
0x1b2e   :  { %2417 = vmatprep.subr.bf16.mxu1 %v2534_v0 }
0x1b31   :  { %2418 = vmatpush3.bf16.msra.mxu1 %v2868_v53 }
0x1b32   :  { %2431 = vmatprep.subr.bf16.mxu1 %v2534_v0 }
0x1bec   :  { %v1606_v27 = vpop.f32.mrf.mxu1 }
0x1bed   :  { %v1612_v29 = vadd.f32 %v1606_v27, %v901_v25 }
0x1bee   :  { %v2405_v63 = vpop.f32.mrf.mxu1 }
0x1bef   :  { %2510 = vtanh.f32 %v1612_v29 }
0x1bf0   :  { %v1609_v30 = vpop.f32.mrf.mxu1 }
0x1bf2   :  { %v2406_v11 = vpop.f32.mrf.mxu1 }
0x1bfc   :  { %v2511_v32 = vpop.eup %2510 }
0x1bfd   :  { %1618 = vrot.lane.b32.xlu0 %v2511_v32, %s2537_s24  ;;  %v1614_v33 = vmul.f32 0.5, %v2511_v32 }
0x1bff   :  { %v1615_v34 = vadd.f32 0.5, %v1614_v33 }
0x1c01   :  { %v1616_v37 = vmul.f32 %v1615_v34, %v1557_v17 }
0x1c6f   :  { %v1619_v35 = vpop.permute.xlu0 %1618 }
0x1c70   :  { %v1621_v36 = vmul.f32 %v1619_v35, %v1615_v34 }
0x1c72   :  { %1623 = vrot.lane.b32.xlu1 %v1621_v36, %s2537_s24 }
0x1ce4   :  { %v1624_v39 = vpop.permute.xlu1 %1623 }
0x1ce5   :  { %v1626_v40 = vadd.f32 %v1624_v39, %v1616_v37 }
0x1ce7   :  { %2512 = vtanh.f32 %v1626_v40 }
0x1cf4   :  { %v2513_v38 = vpop.eup %2512 }
0x1cf5   :  { %1629 = vrot.lane.b32.xlu0 %v2513_v38, %s2537_s24 }
0x1d67   :  { %v1630_v12 = vpop.permute.xlu0 %1629 }
0x1d68   :  { %v1632_v42 = vmul.f32 %v1630_v12, %v1615_v34  ;;  %v1341_v12 = vadd.f32 %v2895_v59, %v2921_v41  ;;  %v2464_v59 = vld [vmem:[%s3026_s5 + $0x8] sm:$0xff]   ;;  %v2465_v41 = vld [vmem:[%s3026_s5] sm:$0xff]  }
0x1d6a   :  { %v1634_v43 = vpack.c.bf16 %v1632_v42, %v1632_v42 }
0x1d6c   :  { %1636 = vrot.lane.b32.xlu1 %v1634_v43, %s2538_s0 }
0x1dde   :  { %v1637_v45 = vpop.permute.xlu1 %1636 }
0x1ddf   :  { %2412 = vmatmul.mubr.msk.bf16.vlgmr.msra.gmra.mxu0 %vm446_vm3, %v1637_v45 }
0x1de0   :  { %2424 = vmatpush3.bf16.msra.mxu0 %v2860_v52  ;;  %2427 = vmatprep.mubr.msk.bf16.mxu0 %vm2535_vm1, %v2534_v0 }
0x1de1   :  { %2425 = vmatprep.subr.bf16.mxu0 %v2534_v0 }
0x1de4   :  { %2426 = vmatpush3.bf16.msra.mxu0 %v2868_v53 }
0x1de5   :  { %2439 = vmatprep.subr.bf16.mxu0 %v2534_v0 }
0x1e9f   :  { %v1675_v46 = vpop.f32.mrf.mxu0 }
0x1ea0   :  { %v1681_v47 = vadd.f32 %v1675_v46, %v1011_v26 }
0x1ea1   :  { %v2413_v48 = vpop.f32.mrf.mxu0 }
0x1ea2   :  { %2514 = vtanh.f32 %v1681_v47 }
0x1ea3   :  { %v1678_v49 = vpop.f32.mrf.mxu0 }
0x1ea5   :  { %v2414_v50 = vpop.f32.mrf.mxu0 }
0x1eaf   :  { %v2515_v51 = vpop.eup %2514 }
0x1eb0   :  { %1687 = vrot.lane.b32.xlu0 %v2515_v51, %s2537_s24  ;;  %v1683_v22 = vmul.f32 0.5, %v2515_v51 }
0x1eb2   :  { %v1684_v54 = vadd.f32 0.5, %v1683_v22 }
0x1eb4   :  { %v1685_v58 = vmul.f32 %v1684_v54, %v1626_v40 }
0x1f22   :  { %v1688_v56 = vpop.permute.xlu0 %1687 }
0x1f23   :  { %v1690_v57 = vmul.f32 %v1688_v56, %v1684_v54 }
0x1f25   :  { %1692 = vrot.lane.b32.xlu1 %v1690_v57, %s2537_s24 }
0x1f97   :  { %v1693_v13 = vpop.permute.xlu1 %1692 }
0x1f98   :  { %v1695_v44 = vadd.f32 %v1693_v13, %v1685_v58 }
0x1f9a   :  { %2516 = vtanh.f32 %v1695_v44 }
0x1fa7   :  { %v2517_v62 = vpop.eup %2516 }
0x1fa8   :  { %1698 = vrot.lane.b32.xlu0 %v2517_v62, %s2537_s24 }
0x201a   :  { %v1699_v18 = vpop.permute.xlu0 %1698 }
0x201b   :  { %v1701_v60 = vmul.f32 %v1699_v18, %v1684_v54  ;;  %v1983_v18 = vld [vmem:[%s3027_s7] sm:$0xf] }
0x201d   :  { %v1703_v61 = vpack.c.bf16 %v1701_v60, %v1701_v60  ;;  %v1995_v60 = vsel %vm49_vm0, %v1983_v18, 0 }
0x201f   :  { %1705 = vrot.lane.b32.xlu1 %v1703_v61, %s2538_s0  ;;  %v2099_v61 = vld [vmem:[%s3029_s6] ss:$0 sm:$0xff] }
0x2091   :  { %v1706_v1 = vpop.permute.xlu1 %1705 }
0x2092   :  { %2420 = vmatmul.mubr.msk.bf16.vlgmr.msra.gmra.mxu1 %vm446_vm3, %v1706_v1 }
0x2093   :  { %2432 = vmatpush3.bf16.msra.mxu1 %v2860_v52  ;;  %2435 = vmatprep.mubr.msk.bf16.mxu1 %vm2535_vm1, %v2534_v0 }
0x2094   :  { %2433 = vmatprep.subr.bf16.mxu1 %v2534_v0 }
0x2097   :  { %2434 = vmatpush3.bf16.msra.mxu1 %v2868_v53 }
0x2098   :  { %2447 = vmatprep.subr.bf16.mxu1 %v2534_v0 }
0x2152   :  { %v1744_v28 = vpop.f32.mrf.mxu1 }
0x2153   :  { %v1750_v8 = vadd.f32 %v1744_v28, %v1121_v2 }
0x2154   :  { %v2421_v3 = vpop.f32.mrf.mxu1 }
0x2155   :  { %2518 = vtanh.f32 %v1750_v8 }
0x2156   :  { %v1747_v5 = vpop.f32.mrf.mxu1 }
0x2158   :  { %v2422_v6 = vpop.f32.mrf.mxu1 }
0x2162   :  { %v2519_v9 = vpop.eup %2518 }
0x2163   :  { %1756 = vrot.lane.b32.xlu0 %v2519_v9, %s2537_s24  ;;  %v1752_v52 = vmul.f32 0.5, %v2519_v9 }
0x2165   :  { %v1753_v10 = vadd.f32 0.5, %v1752_v52 }
0x2167   :  { %v1754_v53 = vmul.f32 %v1753_v10, %v1695_v44 }
0x21d5   :  { %v1757_v14 = vpop.permute.xlu0 %1756 }
0x21d6   :  { %v1759_v15 = vmul.f32 %v1757_v14, %v1753_v10 }
0x21d8   :  { %1761 = vrot.lane.b32.xlu1 %v1759_v15, %s2537_s24 }
0x224a   :  { %v1762_v16 = vpop.permute.xlu1 %1761 }
0x224b   :  { %v1764_v19 = vadd.f32 %v1762_v16, %v1754_v53 }
0x224d   :  { %2520 = vtanh.f32 %v1764_v19 }
0x225a   :  { %v2521_v31 = vpop.eup %2520 }
0x225b   :  { %1767 = vrot.lane.b32.xlu0 %v2521_v31, %s2537_s24 }
0x22cd   :  { %v1768_v20 = vpop.permute.xlu0 %1767 }
0x22ce   :  { %v1770_v17 = vmul.f32 %v1768_v20, %v1753_v10 }
0x22d0   :  { %v1772_v7 = vpack.c.bf16 %v1770_v17, %v1770_v17 }
0x22d2   :  { %1774 = vrot.lane.b32.xlu1 %v1772_v7, %s2538_s0 }
0x2344   :  { %v1775_v21 = vpop.permute.xlu1 %1774 }
0x2345   :  { %2428 = vmatmul.mubr.msk.bf16.vlgmr.msra.gmra.mxu0 %vm446_vm3, %v1775_v21 }
0x2346   :  { %2443 = vmatprep.mubr.msk.bf16.mxu0 %vm2535_vm1, %v2534_v0  ;;  %2440 = vmatpush3.bf16.msra.mxu0 %v2464_v59 }
0x2347   :  { %2441 = vmatprep.subr.bf16.mxu0 %v2534_v0 }
0x234a   :  { %2442 = vmatpush3.bf16.msra.mxu0 %v2465_v41 }
0x2405   :  { %v1813_v23 = vpop.f32.mrf.mxu0 }
0x2406   :  { %v1819_v24 = vadd.f32 %v1813_v23, %v1231_v4 }
0x2407   :  { %v2429_v25 = vpop.f32.mrf.mxu0 }
0x2408   :  { %2522 = vtanh.f32 %v1819_v24 }
0x2409   :  { %v1816_v27 = vpop.f32.mrf.mxu0 }
0x240b   :  { %v2430_v29 = vpop.f32.mrf.mxu0 }
0x2415   :  { %v2523_v63 = vpop.eup %2522 }
0x2416   :  { %1825 = vrot.lane.b32.xlu0 %v2523_v63, %s2537_s24  ;;  %v1821_v30 = vmul.f32 0.5, %v2523_v63 }
0x2418   :  { %v1822_v11 = vadd.f32 0.5, %v1821_v30 }
0x241a   :  { %v1823_v34 = vmul.f32 %v1822_v11, %v1764_v19 }
0x2488   :  { %v1826_v32 = vpop.permute.xlu0 %1825 }
0x2489   :  { %v1828_v33 = vmul.f32 %v1826_v32, %v1822_v11 }
0x248b   :  { %1830 = vrot.lane.b32.xlu1 %v1828_v33, %s2537_s24 }
0x24fd   :  { %v1831_v35 = vpop.permute.xlu1 %1830 }
0x24fe   :  { %v1833_v36 = vadd.f32 %v1831_v35, %v1823_v34 }
0x2500   :  { %2524 = vtanh.f32 %v1833_v36 }
0x250d   :  { %v2525_v55 = vpop.eup %2524 }
0x250e   :  { %1836 = vrot.lane.b32.xlu0 %v2525_v55, %s2537_s24 }
0x2580   :  { %v1837_v37 = vpop.permute.xlu0 %1836 }
0x2581   :  { %v1839_v39 = vmul.f32 %v1837_v37, %v1822_v11 }
0x2583   :  { %v1841_v40 = vpack.c.bf16 %v1839_v39, %v1839_v39 }
0x2585   :  { %1843 = vrot.lane.b32.xlu1 %v1841_v40, %s2538_s0 }
0x25f7   :  { %v1844_v38 = vpop.permute.xlu1 %1843 }
0x25f8   :  { %2436 = vmatmul.mubr.msk.bf16.vlgmr.msra.gmra.mxu1 %vm446_vm3, %v1844_v38 }
0x25f9   :  { %2449 = vmatprep.mubr.msk.bf16.mxu1 %vm2535_vm1, %v2534_v0  ;;  %2448 = vmatpush3.bf16.msra.mxu1 %v1995_v60  ;;  %v14_v0 = vstv %s3028_s8 }
0x25fa   :  { %15 = vst [vmem:[#allocation3] sm:$0x1] %v14_v0 }
0x2601   :  { %v2103_v52 = vld [vmem:[#allocation3] ss:$0 sm:$0xff] }
0x26b8   :  { %v1882_v42 = vpop.f32.mrf.mxu1 }
0x26b9   :  { %v1888_v43 = vadd.f32 %v1882_v42, %v1341_v12 }
0x26ba   :  { %v2437_v45 = vpop.f32.mrf.mxu1 }
0x26bb   :  { %2526 = vtanh.f32 %v1888_v43 }
0x26bc   :  { %v1885_v26 = vpop.f32.mrf.mxu1 }
0x26be   :  { %v2438_v46 = vpop.f32.mrf.mxu1 }
0x26c8   :  { %v2527_v47 = vpop.eup %2526 }
0x26c9   :  { %1894 = vrot.lane.b32.xlu0 %v2527_v47, %s2537_s24  ;;  %v1890_v48 = vmul.f32 0.5, %v2527_v47 }
0x26cb   :  { %v1891_v49 = vadd.f32 0.5, %v1890_v48 }
0x26cd   :  { %v1892_v22 = vmul.f32 %v1891_v49, %v1833_v36 }
0x273b   :  { %v1895_v50 = vpop.permute.xlu0 %1894 }
0x273c   :  { %v1897_v51 = vmul.f32 %v1895_v50, %v1891_v49 }
0x273e   :  { %1899 = vrot.lane.b32.xlu1 %v1897_v51, %s2537_s24 }
0x27b0   :  { %v1900_v54 = vpop.permute.xlu1 %1899 }
0x27b1   :  { %v1902_v56 = vadd.f32 %v1900_v54, %v1892_v22 }
0x27b3   :  { %2528 = vtanh.f32 %v1902_v56 }
0x27c0   :  { %v2529_v57 = vpop.eup %2528 }
0x27c1   :  { %1905 = vrot.lane.b32.xlu0 %v2529_v57, %s2537_s24 }
0x2833   :  { %v1906_v58 = vpop.permute.xlu0 %1905 }
0x2834   :  { %v1908_v13 = vmul.f32 %v1906_v58, %v1891_v49 }
0x2836   :  { %v1909_v44 = vpack.c.bf16 %v1908_v13, %v1908_v13 }
0x2838   :  { %1922 = vrot.lane.b32.xlu1 %v1909_v44, %s2538_s0 }
0x28aa   :  { %v1923_v62 = vpop.permute.xlu1 %1922 }
0x28ab   :  { %2444 = vmatmul.mubr.msk.bf16.vlgmr.msra.gmra.mxu0 %vm446_vm3, %v1923_v62 }
0x296b   :  { %v1973_v1 = vpop.f32.mrf.mxu0 }
0x296c   :  { %v1974_v2 = vadd.f32 %v2099_v61, %v1973_v1 }
0x296d   :  { %v2445_v28 = vpop.f32.mrf.mxu0 }
0x296e   :  { %vm1979_vm4 = vcmp.gt.f32.partialorder %v1974_v2, 0.0  ;;  %v1980_v8 = vmul.f32 0.1, %v1974_v2 }
0x296f   :  { %v1976_v3 = vpop.f32.mrf.mxu0 }
0x2970   :  { %v1981_v5 = vsel %vm1979_vm4, %v1974_v2, %v1980_v8 }
0x2971   :  { %v1982_v6 = vpack.c.bf16 %v1981_v5, %v1981_v5  ;;  %v2446_v9 = vpop.f32.mrf.mxu0 }
0x2973   :  { %2450 = vmatmul.mubr.msk.bf16.vlgmr.msra.gmra.mxu1 %vm45_vm2, %v1982_v6 }
0x2a33   :  { %v2031_v10 = vpop.f32.mrf.mxu1 }
0x2a34   :  { %v2032_v14 = vadd.f32 %v2103_v52, %v2031_v10 }
0x2a35   :  { %v2451_v15 = vpop.f32.mrf.mxu1 }
0x2a36   :  { %v2105_v53 = vmul.f32 -1.442695, %v2032_v14 }
0x2a37   :  { %v2034_v16 = vpop.f32.mrf.mxu1 }
0x2a38   :  { %2530 = vpow2.f32 %v2105_v53 }
0x2a39   :  { %v2452_v19 = vpop.f32.mrf.mxu1 }
0x2a45   :  { %v2531_v31 = vpop.eup %2530 }
0x2a46   :  { %v2040_v20 = vadd.f32 1.0, %v2531_v31 }
0x2a48   :  { %2532 = vrcp.f32 %v2040_v20 }
0x2a55   :  { %v2533_v17 = vpop.eup %2532 }
0x2a56   :  { %2044 = vst.msk [vmem:[%s3030_s9] sm:$0xff] %vm2043_vm5, %v2533_v17 }

</bundles_post_ra>
